<compile_context>
chip_gen: v5e
topology: v5e:2x2
jax: 0.10.0
libtpu: 0.0.40
codegen_flags: <defaults>
</compile_context>

<pallas_src>
import functools

import jax
import jax.numpy as jnp
from jax import lax
from jax.experimental import pallas as pl
from jax.experimental.pallas import tpu as pltpu

EPS = 1e-5


# --------------------------------------------------------------------------
# Kernels.  Layout:
#   x_flat : (NB, C, L)      L   = (H+2)*(W+2), zero-padded image, row-major
#   acc    : (NB, C, Lcp)    Lcp = roundup(H*Wp, 128); column q <-> padded
#            position p = q + Wp + 1 ("q-frame"); interior positions selected
#            with a precomputed {0,1} mask; columns >= Lc are don't-care.
#   patches: (9*C, NB*Lcp)   im2col matrix, one MXU matmul per grid step.
# --------------------------------------------------------------------------

def _conv1_kernel(x_ref, w_ref, maskf_ref, acc_ref, sum_ref, sq_ref,
                  patches_ref, *, NB, Wp, Lc, Lcp, precision):
    C = x_ref.shape[1]
    # Build im2col patches: 9 shifted lane-slices per sample, straight from the
    # input Ref (no whole-frame load), written in the matmul dtype.
    for nb in range(NB):
        for dy in range(3):
            for dx in range(3):
                tap = dy * 3 + dx
                off = dy * Wp + dx
                patches_ref[tap * C:(tap + 1) * C, nb * Lcp:nb * Lcp + Lc] = (
                    x_ref[nb, :, off:off + Lc].astype(patches_ref.dtype))
    # ONE matmul for all NB samples: (Cout, 9C) @ (9C, NB*Lcp), f32 accumulate.
    res = jnp.dot(w_ref[...], patches_ref[...],
                  preferred_element_type=jnp.float32, precision=precision)
    # BN partials over interior positions only, NaN-safe w.r.t. the garbage in
    # the never-written tail columns of the patch scratch.
    am = jnp.where(maskf_ref[...] != 0.0, res, 0.0)
    sum_ref[0] = jnp.sum(am, axis=1, keepdims=True)
    sq_ref[0] = jnp.sum(am * am, axis=1, keepdims=True)
    # Lane-dense per-sample stores (nb*Lcp is 128-aligned).
    for nb in range(NB):
        acc_ref[nb] = res[:, nb * Lcp:(nb + 1) * Lcp].astype(acc_ref.dtype)


def _bn_relu_conv2_kernel(acc1_ref, scale_ref, shift_ref, w_ref, mask_ref,
                          maskf_ref, acc2_ref, sum_ref, sq_ref, ypad_ref,
                          patches_ref, *, NB, Wp, Lc, Lcp, precision):
    C = acc1_ref.shape[1]
    L = ypad_ref.shape[2]
    halo = Wp + 1
    # bn1 (folded scale/shift from globally reduced stats) + relu; non-interior
    # columns forced to zero (NaN-safe) so the re-padded conv2 input is exact.
    y = jnp.where(
        mask_ref[...] != 0.0,
        jnp.maximum(acc1_ref[...].astype(jnp.float32) * scale_ref[...]
                    + shift_ref[...], 0.0),
        0.0).astype(ypad_ref.dtype)
    # Zero only the tiny halo strips of the re-pad buffer (per step: safe under
    # any core sharding of the parallel batch axis), then write the interior.
    ypad_ref[:, :, 0:halo] = jnp.zeros((NB, C, halo), ypad_ref.dtype)
    ypad_ref[:, :, halo + Lc:] = jnp.zeros((NB, C, L - halo - Lc),
                                           ypad_ref.dtype)
    for nb in range(NB):
        ypad_ref[nb, :, halo:halo + Lc] = y[nb, :, :Lc]
        for dy in range(3):
            for dx in range(3):
                tap = dy * 3 + dx
                off = dy * Wp + dx
                patches_ref[tap * C:(tap + 1) * C, nb * Lcp:nb * Lcp + Lc] = (
                    ypad_ref[nb, :, off:off + Lc])
    res = jnp.dot(w_ref[...], patches_ref[...],
                  preferred_element_type=jnp.float32, precision=precision)
    am = jnp.where(maskf_ref[...] != 0.0, res, 0.0)
    sum_ref[0] = jnp.sum(am, axis=1, keepdims=True)
    sq_ref[0] = jnp.sum(am * am, axis=1, keepdims=True)
    for nb in range(NB):
        acc2_ref[nb] = res[:, nb * Lcp:(nb + 1) * Lcp].astype(acc2_ref.dtype)


def _bn_add_relu_kernel(acc2_ref, scale_ref, shift_ref, xq_ref, out_ref):
    z = acc2_ref[...].astype(jnp.float32) * scale_ref[...] + shift_ref[...]
    out_ref[...] = jnp.maximum(z + xq_ref[...], 0.0)


# --------------------------------------------------------------------------
# Wrapper.
# --------------------------------------------------------------------------

def _pick_nb(N, C, L, Lcp):
    """Largest divisor of N whose per-step footprint fits a conservative VMEM
    budget (sized against v7x's 64 MiB/TensorCore; v5e/v6e have 2x headroom)."""
    per_sample = (4 * (2 * C * L + 2 * 2 * C * Lcp)      # dbl-buffered blocks
                  + 2 * (9 * C * Lcp + C * L))           # bf16 scratch
    cap = max(1, (24 * 1024 * 1024) // max(per_sample, 1))
    best = 1
    for d in range(1, N + 1):
        if N % d == 0 and d <= cap:
            best = d
    return best


def basic_block_pallas(x_nchw, w1, g1, b1, w2, g2, b2, *,
                       conv_dtype=jnp.bfloat16, nb=None):
    """BasicBlock forward (BN training-mode batch stats, biased variance).

    x_nchw: (N, C, H, W) f32; w1/w2: (C, C, 3, 3) OIHW; g/b: (C,).
    """
    N, C, H, W = x_nchw.shape
    Cout = w1.shape[0]
    assert Cout == C and w2.shape == (C, C, 3, 3), \
        "identity residual requires inplanes == planes, stride=1, no downsample"
    Hp, Wp = H + 2, W + 2
    L = Hp * Wp
    Lc = H * Wp - 2                              # valid q-frame columns
    Lcp = ((H * Wp + 127) // 128) * 128          # lane-dense padded width
    M = N * H * W                                # BN population size
    exact = (conv_dtype == jnp.float32)
    inter_dtype = jnp.float32 if exact else jnp.bfloat16
    precision = lax.Precision.HIGHEST if exact else None

    NB = nb if nb is not None else _pick_nb(N, C, L, Lcp)
    assert N % NB == 0, "batch must be divisible by the per-step sample count"
    G = N // NB

    x = x_nchw.astype(jnp.float32)
    x_flat = jnp.pad(x, ((0, 0), (0, 0), (1, 1), (1, 1))).reshape(N, C, L)
    x_conv = x_flat.astype(conv_dtype)           # conv1 input (halved DMA on bf16)
    # Identity pre-sliced to the q-frame and lane-padded (f32, exact residual).
    x_q = jnp.pad(x_flat[:, :, Wp + 1:Wp + 1 + Lc],
                  ((0, 0), (0, 0), (0, Lcp - Lc)))

    # (Cout, Cin, 3, 3) -> (Cout, 9*Cin); column index = (dy*3+dx)*Cin + ci.
    def repack(w):
        return (jnp.transpose(w, (0, 2, 3, 1))
                .reshape(Cout, 9 * C).astype(conv_dtype))

    w1m, w2m = repack(w1), repack(w2)

    # {0,1} interior mask over the padded q-frame (per sample, and tiled flat).
    q = jnp.arange(Lcp, dtype=jnp.int32)
    p = q + Wp + 1
    row, col = p // Wp, p % Wp
    interior = (q < Lc) & (row >= 1) & (row <= H) & (col >= 1) & (col <= W)
    mask = interior.astype(jnp.float32).reshape(1, Lcp)
    maskf = jnp.tile(mask, (1, NB))              # (1, NB*Lcp)

    grid = (G,)
    cparams = pltpu.CompilerParams(
        dimension_semantics=("parallel",),       # independent batch blocks
        vmem_limit_bytes=32 * 1024 * 1024)

    x_spec = pl.BlockSpec((NB, C, L), lambda n: (n, 0, 0))
    xq_spec = pl.BlockSpec((NB, C, Lcp), lambda n: (n, 0, 0))
    w_spec = pl.BlockSpec((Cout, 9 * C), lambda n: (0, 0))
    m_spec = pl.BlockSpec((1, Lcp), lambda n: (0, 0))
    mf_spec = pl.BlockSpec((1, NB * Lcp), lambda n: (0, 0))
    acc_spec = pl.BlockSpec((NB, Cout, Lcp), lambda n: (n, 0, 0))
    st_spec = pl.BlockSpec((1, Cout, 1), lambda n: (n, 0, 0))
    vec_spec = pl.BlockSpec((Cout, 1), lambda n: (0, 0))

    acc_shape = jax.ShapeDtypeStruct((N, Cout, Lcp), inter_dtype)
    st_shape = jax.ShapeDtypeStruct((G, Cout, 1), jnp.float32)
    out_shape = jax.ShapeDtypeStruct((N, Cout, Lcp), jnp.float32)

    # ---- pass 1: conv1 + per-step BN partials ----------------------------
    acc1, s1, q1 = pl.pallas_call(
        functools.partial(_conv1_kernel, NB=NB, Wp=Wp, Lc=Lc, Lcp=Lcp,
                          precision=precision),
        grid=grid,
        in_specs=[x_spec, w_spec, mf_spec],
        out_specs=[acc_spec, st_spec, st_spec],
        out_shape=[acc_shape, st_shape, st_shape],
        scratch_shapes=[pltpu.VMEM((9 * C, NB * Lcp), conv_dtype)],
        compiler_params=cparams,
    )(x_conv, w1m, maskf)

    def fold_bn(s_part, q_part, gamma, beta):
        # Tiny cross-step reduction + rsqrt in plain JAX (f32 throughout).
        s = jnp.sum(s_part[:, :, 0], axis=0)
        ss = jnp.sum(q_part[:, :, 0], axis=0)
        mean = s / M
        var = ss / M - mean * mean               # biased var (BN training mode)
        scale = gamma.astype(jnp.float32) * lax.rsqrt(var + EPS)
        shift = beta.astype(jnp.float32) - mean * scale
        return scale.reshape(Cout, 1), shift.reshape(Cout, 1)

    scale1, shift1 = fold_bn(s1, q1, g1, b1)

    # ---- pass 2: bn1 + relu + halo re-pad + conv2 + partials --------------
    acc2, s2, q2 = pl.pallas_call(
        functools.partial(_bn_relu_conv2_kernel, NB=NB, Wp=Wp, Lc=Lc, Lcp=Lcp,
                          precision=precision),
        grid=grid,
        in_specs=[acc_spec, vec_spec, vec_spec, w_spec, m_spec, mf_spec],
        out_specs=[acc_spec, st_spec, st_spec],
        out_shape=[acc_shape, st_shape, st_shape],
        scratch_shapes=[pltpu.VMEM((NB, Cout, L), conv_dtype),
                        pltpu.VMEM((9 * Cout, NB * Lcp), conv_dtype)],
        compiler_params=cparams,
    )(acc1, scale1, shift1, w2m, mask, maskf)

    scale2, shift2 = fold_bn(s2, q2, g2, b2)

    # ---- pass 3: bn2 + residual add + relu --------------------------------
    out_q = pl.pallas_call(
        _bn_add_relu_kernel,
        grid=grid,
        in_specs=[acc_spec, vec_spec, vec_spec, xq_spec],
        out_specs=pl.BlockSpec((NB, Cout, Lcp), lambda n: (n, 0, 0)),
        out_shape=out_shape,
        compiler_params=cparams,
    )(acc2, scale2, shift2, x_q)

    # q-frame (q = h*Wp + w) -> NCHW interior; no padded full-frame round trip.
    return out_q[:, :, :H * Wp].reshape(N, C, H, Wp)[:, :, :, :W]


# --------------------------------------------------------------------------
# Plain-JAX reference mirroring PyTorch BasicBlock.forward (BN training mode).
# --------------------------------------------------------------------------

def basic_block_reference(x_nchw, w1, g1, b1, w2, g2, b2, *,
                          conv_dtype=jnp.float32):
    precision = (lax.Precision.HIGHEST if conv_dtype == jnp.float32 else None)

    def conv3x3(x, w):
        return lax.conv_general_dilated(
            x.astype(conv_dtype), w.astype(conv_dtype),
            window_strides=(1, 1), padding=((1, 1), (1, 1)),
            dimension_numbers=("NCHW", "OIHW", "NCHW"),
            preferred_element_type=jnp.float32, precision=precision)

    def bn(x, g, b):
        mu = jnp.mean(x, axis=(0, 2, 3), keepdims=True)
        var = jnp.mean((x - mu) ** 2, axis=(0, 2, 3), keepdims=True)
        return (x - mu) * lax.rsqrt(var + EPS) * g.reshape(1, -1, 1, 1) \
            + b.reshape(1, -1, 1, 1)

    out = jnp.maximum(bn(conv3x3(x_nchw, w1), g1, b1), 0.0)
    out = bn(conv3x3(out, w2), g2, b2)
    return jnp.maximum(out + x_nchw, 0.0)


if __name__ == "__main__":
    # inplanes = planes = 4, stride = 1, downsample = None
    N, C, H, W = 2, 4, 16, 16
    key = jax.random.PRNGKey(0)
    kx, k1, k2, k3, k4, k5, k6 = jax.random.split(key, 7)

    x = jax.random.normal(kx, (N, C, H, W), jnp.float32)
    w1 = jax.random.normal(k1, (C, C, 3, 3), jnp.float32) * 0.2
    w2 = jax.random.normal(k2, (C, C, 3, 3), jnp.float32) * 0.2
    gamma1 = 1.0 + 0.1 * jax.random.normal(k3, (C,), jnp.float32)
    beta1 = 0.1 * jax.random.normal(k4, (C,), jnp.float32)
    gamma2 = 1.0 + 0.1 * jax.random.normal(k5, (C,), jnp.float32)
    beta2 = 0.1 * jax.random.normal(k6, (C,), jnp.float32)

    args = (x, w1, gamma1, beta1, w2, gamma2, beta2)

    # Exact-numerics check: f32 MXU inputs + f32 intermediates + HIGHEST.
    out = jax.block_until_ready(basic_block_pallas(*args, conv_dtype=jnp.float32))
    ref = jax.block_until_ready(basic_block_reference(*args, conv_dtype=jnp.float32))
    assert out.shape == (N, C, H, W)
    if not jnp.allclose(out, ref, rtol=2e-4, atol=2e-4):
        raise AssertionError("Pallas f32 output mismatch vs reference")

    # Fast path (default): bf16 MXU inputs + bf16 HBM intermediates.
    out_f = jax.block_until_ready(basic_block_pallas(*args, conv_dtype=jnp.bfloat16))
    ref_f = jax.block_until_ready(basic_block_reference(*args, conv_dtype=jnp.bfloat16))
    if not jnp.allclose(out_f, ref_f, rtol=3e-2, atol=3e-2):
        raise AssertionError("Pallas bf16 output mismatch vs reference")

    print("KERNEL_OK")
</pallas_src>

<mosaic_0001>
module attributes {stable_mosaic.version = 11 : i64} {
  func.func @_conv1_kernel(%arg0: i32, %arg1: memref<2x4x324xf32, #tpu.memory_space<vmem>>, %arg2: memref<4x36xf32, #tpu.memory_space<vmem>>, %arg3: memref<1x768xf32, #tpu.memory_space<vmem>>, %arg4: memref<2x4x384xf32, #tpu.memory_space<vmem>>, %arg5: memref<1x4x1xf32, #tpu.memory_space<vmem>>, %arg6: memref<1x4x1xf32, #tpu.memory_space<vmem>>, %arg7: memref<36x768xf32, #tpu.memory_space<vmem>>) attributes {dimension_semantics = [#tpu.dimension_semantics<parallel>], iteration_bounds = array<i64: 1>, scalar_prefetch = 0 : i64, scratch_operands = 1 : i64, tpu.core_type = #tpu.core_type<tc>, window_params = [{transform_indices = @transform_0, window_bounds = array<i64: 2, 4, 324>}, {pipeline_mode = #tpu.pipeline_mode<synchronous>, transform_indices = @transform_1, window_bounds = array<i64: 4, 36>}, {pipeline_mode = #tpu.pipeline_mode<synchronous>, transform_indices = @transform_2, window_bounds = array<i64: 1, 768>}, {transform_indices = @transform_3, window_bounds = array<i64: 2, 4, 384>}, {transform_indices = @transform_4, window_bounds = array<i64: 1, 4, 1>}, {transform_indices = @transform_5, window_bounds = array<i64: 1, 4, 1>}]} {
    %c0 = arith.constant 0 : index
    %c0_0 = arith.constant 0 : index
    %c0_1 = arith.constant 0 : index
    %0 = vector.load %arg1[%c0, %c0_0, %c0_1] : memref<2x4x324xf32, #tpu.memory_space<vmem>>, vector<1x4x286xf32>
    %1 = vector.shape_cast %0 : vector<1x4x286xf32> to vector<4x286xf32>
    %c0_2 = arith.constant 0 : index
    %c0_3 = arith.constant 0 : index
    %2 = vector.load %arg7[%c0_2, %c0_3] : memref<36x768xf32, #tpu.memory_space<vmem>>, vector<4x286xf32>
    tpu.vector_store %arg7[%c0_2, %c0_3], %1 {strides = array<i32>} : memref<36x768xf32, #tpu.memory_space<vmem>>, vector<4x286xf32>,
    %c0_4 = arith.constant 0 : index
    %c0_5 = arith.constant 0 : index
    %c1 = arith.constant 1 : index
    %3 = vector.load %arg1[%c0_4, %c0_5, %c1] : memref<2x4x324xf32, #tpu.memory_space<vmem>>, vector<1x4x286xf32>
    %4 = vector.shape_cast %3 : vector<1x4x286xf32> to vector<4x286xf32>
    %c4 = arith.constant 4 : index
    %c0_6 = arith.constant 0 : index
    %5 = vector.load %arg7[%c4, %c0_6] : memref<36x768xf32, #tpu.memory_space<vmem>>, vector<4x286xf32>
    tpu.vector_store %arg7[%c4, %c0_6], %4 {strides = array<i32>} : memref<36x768xf32, #tpu.memory_space<vmem>>, vector<4x286xf32>,
    %c0_7 = arith.constant 0 : index
    %c0_8 = arith.constant 0 : index
    %c2 = arith.constant 2 : index
    %6 = vector.load %arg1[%c0_7, %c0_8, %c2] : memref<2x4x324xf32, #tpu.memory_space<vmem>>, vector<1x4x286xf32>
    %7 = vector.shape_cast %6 : vector<1x4x286xf32> to vector<4x286xf32>
    %c8 = arith.constant 8 : index
    %c0_9 = arith.constant 0 : index
    %8 = vector.load %arg7[%c8, %c0_9] : memref<36x768xf32, #tpu.memory_space<vmem>>, vector<4x286xf32>
    tpu.vector_store %arg7[%c8, %c0_9], %7 {strides = array<i32>} : memref<36x768xf32, #tpu.memory_space<vmem>>, vector<4x286xf32>,
    %c0_10 = arith.constant 0 : index
    %c0_11 = arith.constant 0 : index
    %c18 = arith.constant 18 : index
    %9 = vector.load %arg1[%c0_10, %c0_11, %c18] : memref<2x4x324xf32, #tpu.memory_space<vmem>>, vector<1x4x286xf32>
    %10 = vector.shape_cast %9 : vector<1x4x286xf32> to vector<4x286xf32>
    %c12 = arith.constant 12 : index
    %c0_12 = arith.constant 0 : index
    %11 = vector.load %arg7[%c12, %c0_12] : memref<36x768xf32, #tpu.memory_space<vmem>>, vector<4x286xf32>
    tpu.vector_store %arg7[%c12, %c0_12], %10 {strides = array<i32>} : memref<36x768xf32, #tpu.memory_space<vmem>>, vector<4x286xf32>,
    %c0_13 = arith.constant 0 : index
    %c0_14 = arith.constant 0 : index
    %c19 = arith.constant 19 : index
    %12 = vector.load %arg1[%c0_13, %c0_14, %c19] : memref<2x4x324xf32, #tpu.memory_space<vmem>>, vector<1x4x286xf32>
    %13 = vector.shape_cast %12 : vector<1x4x286xf32> to vector<4x286xf32>
    %c16 = arith.constant 16 : index
    %c0_15 = arith.constant 0 : index
    %14 = vector.load %arg7[%c16, %c0_15] : memref<36x768xf32, #tpu.memory_space<vmem>>, vector<4x286xf32>
    tpu.vector_store %arg7[%c16, %c0_15], %13 {strides = array<i32>} : memref<36x768xf32, #tpu.memory_space<vmem>>, vector<4x286xf32>,
    %c0_16 = arith.constant 0 : index
    %c0_17 = arith.constant 0 : index
    %c20 = arith.constant 20 : index
    %15 = vector.load %arg1[%c0_16, %c0_17, %c20] : memref<2x4x324xf32, #tpu.memory_space<vmem>>, vector<1x4x286xf32>
    %16 = vector.shape_cast %15 : vector<1x4x286xf32> to vector<4x286xf32>
    %c20_18 = arith.constant 20 : index
    %c0_19 = arith.constant 0 : index
    %17 = vector.load %arg7[%c20_18, %c0_19] : memref<36x768xf32, #tpu.memory_space<vmem>>, vector<4x286xf32>
    tpu.vector_store %arg7[%c20_18, %c0_19], %16 {strides = array<i32>} : memref<36x768xf32, #tpu.memory_space<vmem>>, vector<4x286xf32>,
    %c0_20 = arith.constant 0 : index
    %c0_21 = arith.constant 0 : index
    %c36 = arith.constant 36 : index
    %18 = vector.load %arg1[%c0_20, %c0_21, %c36] : memref<2x4x324xf32, #tpu.memory_space<vmem>>, vector<1x4x286xf32>
    %19 = vector.shape_cast %18 : vector<1x4x286xf32> to vector<4x286xf32>
    %c24 = arith.constant 24 : index
    %c0_22 = arith.constant 0 : index
    %20 = vector.load %arg7[%c24, %c0_22] : memref<36x768xf32, #tpu.memory_space<vmem>>, vector<4x286xf32>
    tpu.vector_store %arg7[%c24, %c0_22], %19 {strides = array<i32>} : memref<36x768xf32, #tpu.memory_space<vmem>>, vector<4x286xf32>,
    %c0_23 = arith.constant 0 : index
    %c0_24 = arith.constant 0 : index
    %c37 = arith.constant 37 : index
    %21 = vector.load %arg1[%c0_23, %c0_24, %c37] : memref<2x4x324xf32, #tpu.memory_space<vmem>>, vector<1x4x286xf32>
    %22 = vector.shape_cast %21 : vector<1x4x286xf32> to vector<4x286xf32>
    %c28 = arith.constant 28 : index
    %c0_25 = arith.constant 0 : index
    %23 = vector.load %arg7[%c28, %c0_25] : memref<36x768xf32, #tpu.memory_space<vmem>>, vector<4x286xf32>
    tpu.vector_store %arg7[%c28, %c0_25], %22 {strides = array<i32>} : memref<36x768xf32, #tpu.memory_space<vmem>>, vector<4x286xf32>,
    %c0_26 = arith.constant 0 : index
    %c0_27 = arith.constant 0 : index
    %c38 = arith.constant 38 : index
    %24 = vector.load %arg1[%c0_26, %c0_27, %c38] : memref<2x4x324xf32, #tpu.memory_space<vmem>>, vector<1x4x286xf32>
    %25 = vector.shape_cast %24 : vector<1x4x286xf32> to vector<4x286xf32>
    %c32 = arith.constant 32 : index
    %c0_28 = arith.constant 0 : index
    %26 = vector.load %arg7[%c32, %c0_28] : memref<36x768xf32, #tpu.memory_space<vmem>>, vector<4x286xf32>
    tpu.vector_store %arg7[%c32, %c0_28], %25 {strides = array<i32>} : memref<36x768xf32, #tpu.memory_space<vmem>>, vector<4x286xf32>,
    %c1_29 = arith.constant 1 : index
    %c0_30 = arith.constant 0 : index
    %c0_31 = arith.constant 0 : index
    %27 = vector.load %arg1[%c1_29, %c0_30, %c0_31] : memref<2x4x324xf32, #tpu.memory_space<vmem>>, vector<1x4x286xf32>
    %28 = vector.shape_cast %27 : vector<1x4x286xf32> to vector<4x286xf32>
    %c0_32 = arith.constant 0 : index
    %c384 = arith.constant 384 : index
    %29 = vector.load %arg7[%c0_32, %c384] : memref<36x768xf32, #tpu.memory_space<vmem>>, vector<4x286xf32>
    tpu.vector_store %arg7[%c0_32, %c384], %28 {strides = array<i32>} : memref<36x768xf32, #tpu.memory_space<vmem>>, vector<4x286xf32>,
    %c1_33 = arith.constant 1 : index
    %c0_34 = arith.constant 0 : index
    %c1_35 = arith.constant 1 : index
    %30 = vector.load %arg1[%c1_33, %c0_34, %c1_35] : memref<2x4x324xf32, #tpu.memory_space<vmem>>, vector<1x4x286xf32>
    %31 = vector.shape_cast %30 : vector<1x4x286xf32> to vector<4x286xf32>
    %c4_36 = arith.constant 4 : index
    %c384_37 = arith.constant 384 : index
    %32 = vector.load %arg7[%c4_36, %c384_37] : memref<36x768xf32, #tpu.memory_space<vmem>>, vector<4x286xf32>
    tpu.vector_store %arg7[%c4_36, %c384_37], %31 {strides = array<i32>} : memref<36x768xf32, #tpu.memory_space<vmem>>, vector<4x286xf32>,
    %c1_38 = arith.constant 1 : index
    %c0_39 = arith.constant 0 : index
    %c2_40 = arith.constant 2 : index
    %33 = vector.load %arg1[%c1_38, %c0_39, %c2_40] : memref<2x4x324xf32, #tpu.memory_space<vmem>>, vector<1x4x286xf32>
    %34 = vector.shape_cast %33 : vector<1x4x286xf32> to vector<4x286xf32>
    %c8_41 = arith.constant 8 : index
    %c384_42 = arith.constant 384 : index
    %35 = vector.load %arg7[%c8_41, %c384_42] : memref<36x768xf32, #tpu.memory_space<vmem>>, vector<4x286xf32>
    tpu.vector_store %arg7[%c8_41, %c384_42], %34 {strides = array<i32>} : memref<36x768xf32, #tpu.memory_space<vmem>>, vector<4x286xf32>,
    %c1_43 = arith.constant 1 : index
    %c0_44 = arith.constant 0 : index
    %c18_45 = arith.constant 18 : index
    %36 = vector.load %arg1[%c1_43, %c0_44, %c18_45] : memref<2x4x324xf32, #tpu.memory_space<vmem>>, vector<1x4x286xf32>
    %37 = vector.shape_cast %36 : vector<1x4x286xf32> to vector<4x286xf32>
    %c12_46 = arith.constant 12 : index
    %c384_47 = arith.constant 384 : index
    %38 = vector.load %arg7[%c12_46, %c384_47] : memref<36x768xf32, #tpu.memory_space<vmem>>, vector<4x286xf32>
    tpu.vector_store %arg7[%c12_46, %c384_47], %37 {strides = array<i32>} : memref<36x768xf32, #tpu.memory_space<vmem>>, vector<4x286xf32>,
    %c1_48 = arith.constant 1 : index
    %c0_49 = arith.constant 0 : index
    %c19_50 = arith.constant 19 : index
    %39 = vector.load %arg1[%c1_48, %c0_49, %c19_50] : memref<2x4x324xf32, #tpu.memory_space<vmem>>, vector<1x4x286xf32>
    %40 = vector.shape_cast %39 : vector<1x4x286xf32> to vector<4x286xf32>
    %c16_51 = arith.constant 16 : index
    %c384_52 = arith.constant 384 : index
    %41 = vector.load %arg7[%c16_51, %c384_52] : memref<36x768xf32, #tpu.memory_space<vmem>>, vector<4x286xf32>
    tpu.vector_store %arg7[%c16_51, %c384_52], %40 {strides = array<i32>} : memref<36x768xf32, #tpu.memory_space<vmem>>, vector<4x286xf32>,
    %c1_53 = arith.constant 1 : index
    %c0_54 = arith.constant 0 : index
    %c20_55 = arith.constant 20 : index
    %42 = vector.load %arg1[%c1_53, %c0_54, %c20_55] : memref<2x4x324xf32, #tpu.memory_space<vmem>>, vector<1x4x286xf32>
    %43 = vector.shape_cast %42 : vector<1x4x286xf32> to vector<4x286xf32>
    %c20_56 = arith.constant 20 : index
    %c384_57 = arith.constant 384 : index
    %44 = vector.load %arg7[%c20_56, %c384_57] : memref<36x768xf32, #tpu.memory_space<vmem>>, vector<4x286xf32>
    tpu.vector_store %arg7[%c20_56, %c384_57], %43 {strides = array<i32>} : memref<36x768xf32, #tpu.memory_space<vmem>>, vector<4x286xf32>,
    %c1_58 = arith.constant 1 : index
    %c0_59 = arith.constant 0 : index
    %c36_60 = arith.constant 36 : index
    %45 = vector.load %arg1[%c1_58, %c0_59, %c36_60] : memref<2x4x324xf32, #tpu.memory_space<vmem>>, vector<1x4x286xf32>
    %46 = vector.shape_cast %45 : vector<1x4x286xf32> to vector<4x286xf32>
    %c24_61 = arith.constant 24 : index
    %c384_62 = arith.constant 384 : index
    %47 = vector.load %arg7[%c24_61, %c384_62] : memref<36x768xf32, #tpu.memory_space<vmem>>, vector<4x286xf32>
    tpu.vector_store %arg7[%c24_61, %c384_62], %46 {strides = array<i32>} : memref<36x768xf32, #tpu.memory_space<vmem>>, vector<4x286xf32>,
    %c1_63 = arith.constant 1 : index
    %c0_64 = arith.constant 0 : index
    %c37_65 = arith.constant 37 : index
    %48 = vector.load %arg1[%c1_63, %c0_64, %c37_65] : memref<2x4x324xf32, #tpu.memory_space<vmem>>, vector<1x4x286xf32>
    %49 = vector.shape_cast %48 : vector<1x4x286xf32> to vector<4x286xf32>
    %c28_66 = arith.constant 28 : index
    %c384_67 = arith.constant 384 : index
    %50 = vector.load %arg7[%c28_66, %c384_67] : memref<36x768xf32, #tpu.memory_space<vmem>>, vector<4x286xf32>
    tpu.vector_store %arg7[%c28_66, %c384_67], %49 {strides = array<i32>} : memref<36x768xf32, #tpu.memory_space<vmem>>, vector<4x286xf32>,
    %c1_68 = arith.constant 1 : index
    %c0_69 = arith.constant 0 : index
    %c38_70 = arith.constant 38 : index
    %51 = vector.load %arg1[%c1_68, %c0_69, %c38_70] : memref<2x4x324xf32, #tpu.memory_space<vmem>>, vector<1x4x286xf32>
    %52 = vector.shape_cast %51 : vector<1x4x286xf32> to vector<4x286xf32>
    %c32_71 = arith.constant 32 : index
    %c384_72 = arith.constant 384 : index
    %53 = vector.load %arg7[%c32_71, %c384_72] : memref<36x768xf32, #tpu.memory_space<vmem>>, vector<4x286xf32>
    tpu.vector_store %arg7[%c32_71, %c384_72], %52 {strides = array<i32>} : memref<36x768xf32, #tpu.memory_space<vmem>>, vector<4x286xf32>,
    %c0_73 = arith.constant 0 : index
    %c0_74 = arith.constant 0 : index
    %54 = vector.load %arg2[%c0_73, %c0_74] : memref<4x36xf32, #tpu.memory_space<vmem>>, vector<4x36xf32>
    %c0_75 = arith.constant 0 : index
    %c0_76 = arith.constant 0 : index
    %55 = vector.load %arg7[%c0_75, %c0_76] : memref<36x768xf32, #tpu.memory_space<vmem>>, vector<36x768xf32>
    %cst = arith.constant dense<0.000000e+00> : vector<4x768xf32>
    %56 = tpu.matmul %54, %55, %cst {dimension_numbers = #tpu.dot_dimension_numbers<[1], [0], [0], [1], [0, 0, 1, 1], [], []>, precision = #tpu.contract_precision<fp32>} : vector<4x36xf32>, vector<36x768xf32>, vector<4x768xf32> -> vector<4x768xf32>
    %c0_77 = arith.constant 0 : index
    %c0_78 = arith.constant 0 : index
    %57 = vector.load %arg3[%c0_77, %c0_78] : memref<1x768xf32, #tpu.memory_space<vmem>>, vector<1x768xf32>
    %cst_79 = arith.constant 0.000000e+00 : f32
    %58 = vector.broadcast %cst_79 : f32 to vector<1x768xf32>
    %59 = arith.cmpf one, %57, %58 : vector<1x768xf32>
    %cst_80 = arith.constant 0.000000e+00 : f32
    %60 = vector.shape_cast %59 : vector<1x768xi1> to vector<1x768xi1>
    %61 = vector.broadcast %60 : vector<1x768xi1> to vector<4x768xi1>
    %62 = vector.broadcast %cst_80 : f32 to vector<4x768xf32>
    %63 = arith.select %61, %56, %62 : vector<4x768xi1>, vector<4x768xf32>
    %cst_81 = arith.constant dense<0.000000e+00> : vector<4xf32>
    %64 = vector.multi_reduction <add>, %63, %cst_81 [1] : vector<4x768xf32> to vector<4xf32>
    %65 = vector.shape_cast %64 : vector<4xf32> to vector<4x1xf32>
    %c0_82 = arith.constant 0 : index
    %c0_83 = arith.constant 0 : index
    %c0_84 = arith.constant 0 : index
    %66 = vector.load %arg5[%c0_82, %c0_83, %c0_84] : memref<1x4x1xf32, #tpu.memory_space<vmem>>, vector<1x4x1xf32>
    %67 = vector.shape_cast %66 : vector<1x4x1xf32> to vector<4x1xf32>
    %68 = vector.shape_cast %65 : vector<4x1xf32> to vector<1x4x1xf32>
    tpu.vector_store %arg5[%c0_82, %c0_83, %c0_84], %68 {strides = array<i32>} : memref<1x4x1xf32, #tpu.memory_space<vmem>>, vector<1x4x1xf32>,
    %69 = arith.mulf %63, %63 : vector<4x768xf32>
    %cst_85 = arith.constant dense<0.000000e+00> : vector<4xf32>
    %70 = vector.multi_reduction <add>, %69, %cst_85 [1] : vector<4x768xf32> to vector<4xf32>
    %71 = vector.shape_cast %70 : vector<4xf32> to vector<4x1xf32>
    %c0_86 = arith.constant 0 : index
    %c0_87 = arith.constant 0 : index
    %c0_88 = arith.constant 0 : index
    %72 = vector.load %arg6[%c0_86, %c0_87, %c0_88] : memref<1x4x1xf32, #tpu.memory_space<vmem>>, vector<1x4x1xf32>
    %73 = vector.shape_cast %72 : vector<1x4x1xf32> to vector<4x1xf32>
    %74 = vector.shape_cast %71 : vector<4x1xf32> to vector<1x4x1xf32>
    tpu.vector_store %arg6[%c0_86, %c0_87, %c0_88], %74 {strides = array<i32>} : memref<1x4x1xf32, #tpu.memory_space<vmem>>, vector<1x4x1xf32>,
    %75 = vector.extract_strided_slice %56 {offsets = [0, 0], sizes = [4, 384], strides = [1, 1]} : vector<4x768xf32> to vector<4x384xf32>
    %c0_89 = arith.constant 0 : index
    %c0_90 = arith.constant 0 : index
    %c0_91 = arith.constant 0 : index
    %76 = vector.load %arg4[%c0_89, %c0_90, %c0_91] : memref<2x4x384xf32, #tpu.memory_space<vmem>>, vector<1x4x384xf32>
    %77 = vector.shape_cast %76 : vector<1x4x384xf32> to vector<4x384xf32>
    %78 = vector.shape_cast %75 : vector<4x384xf32> to vector<1x4x384xf32>
    tpu.vector_store %arg4[%c0_89, %c0_90, %c0_91], %78 {strides = array<i32>} : memref<2x4x384xf32, #tpu.memory_space<vmem>>, vector<1x4x384xf32>,
    %79 = vector.extract_strided_slice %56 {offsets = [0, 384], sizes = [4, 384], strides = [1, 1]} : vector<4x768xf32> to vector<4x384xf32>
    %c1_92 = arith.constant 1 : index
    %c0_93 = arith.constant 0 : index
    %c0_94 = arith.constant 0 : index
    %80 = vector.load %arg4[%c1_92, %c0_93, %c0_94] : memref<2x4x384xf32, #tpu.memory_space<vmem>>, vector<1x4x384xf32>
    %81 = vector.shape_cast %80 : vector<1x4x384xf32> to vector<4x384xf32>
    %82 = vector.shape_cast %79 : vector<4x384xf32> to vector<1x4x384xf32>
    tpu.vector_store %arg4[%c1_92, %c0_93, %c0_94], %82 {strides = array<i32>} : memref<2x4x384xf32, #tpu.memory_space<vmem>>, vector<1x4x384xf32>,
    return
  }
  func.func @transform_0(%arg0: i32) -> (i32, i32, i32) {
    %c0_i32 = arith.constant 0 : i32
    %c0_i32_0 = arith.constant 0 : i32
    %c0_i32_1 = arith.constant 0 : i32
    return %arg0, %c0_i32, %c0_i32_0 : i32, i32, i32
  }
  func.func @transform_1(%arg0: i32) -> (i32, i32) {
    %c0_i32 = arith.constant 0 : i32
    %c0_i32_0 = arith.constant 0 : i32
    %c0_i32_1 = arith.constant 0 : i32
    return %c0_i32, %c0_i32_0 : i32, i32
  }
  func.func @transform_2(%arg0: i32) -> (i32, i32) {
    %c0_i32 = arith.constant 0 : i32
    %c0_i32_0 = arith.constant 0 : i32
    %c0_i32_1 = arith.constant 0 : i32
    return %c0_i32, %c0_i32_0 : i32, i32
  }
  func.func @transform_3(%arg0: i32) -> (i32, i32, i32) {
    %c0_i32 = arith.constant 0 : i32
    %c0_i32_0 = arith.constant 0 : i32
    %c0_i32_1 = arith.constant 0 : i32
    return %arg0, %c0_i32, %c0_i32_0 : i32, i32, i32
  }
  func.func @transform_4(%arg0: i32) -> (i32, i32, i32) {
    %c0_i32 = arith.constant 0 : i32
    %c0_i32_0 = arith.constant 0 : i32
    %c0_i32_1 = arith.constant 0 : i32
    return %arg0, %c0_i32, %c0_i32_0 : i32, i32, i32
  }
  func.func @transform_5(%arg0: i32) -> (i32, i32, i32) {
    %c0_i32 = arith.constant 0 : i32
    %c0_i32_0 = arith.constant 0 : i32
    %c0_i32_1 = arith.constant 0 : i32
    return %arg0, %c0_i32, %c0_i32_0 : i32, i32, i32
  }
}

</mosaic_0001>

<bundles_post_ra>
// kernel: tpu_custom_call.1
= control target key start
LH: loop header
LB: loop body
LE: loop exit
PB: predicated region body
PF: predicated region fallthrough
CT: control target
= control target key end

     0   :  { %11 = vsyncpa [#allocation4], 0  ;;  %s2559_s0 = inlined_call_operand.hbm [shape: f32[2,4,324], index: 0, kind: input, shape index: {}]   ;;  %s2560_s1 = inlined_call_operand.hbm [shape: f32[4,36], index: 1, kind: input, shape index: {}]   ;;  %s2561_s2 = inlined_call_operand.hbm [shape: f32[1,768], index: 2, kind: input, shape index: {}]   ;;  %s2562_s3 = inlined_call_operand.hbm [shape: f32[2,4,384], index: 3, kind: output, shape index: {0}]   ;;  %s2563_s4 = inlined_call_operand.vmem [shape: f32[1,4,1], index: 4, kind: output, shape index: {1}]   ;;  %s2564_s5 = inlined_call_operand.vmem [shape: f32[1,4,1], index: 5, kind: output, shape index: {2}]  }
   0x1   :  { %12 = vsyncpa [#allocation7], 0  ;;  %s32_s20 = sshll.u32 %s2560_s1, 4  ;;  %s33_s20 = int_to_ptr.hbm [resolvable:$true] %s32_s20 }
   0x2   :  { %13 = vsyncpa [#allocation5], 0  ;;  %s1954_s21 = smov [#allocation6]   ;;  %s18_s25 = sshll.u32 %s2559_s0, 4  ;;  %s19_s25 = int_to_ptr.hbm [resolvable:$true] %s18_s25 }
   0x3   :  { %s34_s22 = sshll.u32 %s1954_s21, 4  ;;  %s1955_s26 = smov [#allocation3]   ;;  %s35_s22 = int_to_ptr.vmem [resolvable:$true] %s34_s22 }
   0x4   :  { %37 = dma.hbm_to_vmem [thread:$0]  %s33_s20, 64, %s35_s22, [#allocation7]  }
   0x5   :  { %s20_s27 = sshll.u32 %s1955_s26, 4  ;;  %s1956_s28 = smov 192   ;;  %s21_s27 = int_to_ptr.vmem [resolvable:$true] %s20_s27 }
   0x6   :  { %s1957_s29 = smov 12   ;;  %s43_s6 = sshll.u32 %s2561_s2, 4  ;;  %s44_s6 = int_to_ptr.hbm [resolvable:$true] %s43_s6 }
   0x7   :  { %26 = dma.hbm_to_vmem [thread:$0]  %s19_s25, 384, %s21_s27, [#allocation4], %s1956_s28, %s1956_s28, %s1957_s29  }
   0x8   :  { %s1958_s7 = smov [#allocation8]  }
   0x9   :  { %s45_s8 = sshll.u32 %s1958_s7, 4  ;;  %s46_s8 = int_to_ptr.vmem [resolvable:$true] %s45_s8 }
   0xa   :  { %48 = dma.hbm_to_vmem [thread:$0]  %s44_s6, 96, %s46_s8, [#allocation7]  }
   0xb   :  { %1948 = dma.done.wait [#allocation4], 384  }
   0xc   :  { %1949 = vsyncadd [#allocation4], 4294966912 }
   0xd   :  { %1950 = dma.done.wait [#allocation7], 160  }
   0xe   :  { %1951 = vsyncadd [#allocation7], 4294967136  ;;  %v2011_v0 = vld [vmem:[#allocation3] sm:$0xff]  ;;  %v62_v1 = vld [vmem:[#allocation3 + $0x8] sm:$0xf]  ;;  %s1959_s0 = smov 127  }
   0xf   :  { %65 = vst [vmem:[#allocation1] ss:$2 sm:$0xff] %v2011_v0  ;;  %v79_v2 = vld [vmem:[#allocation3 + $0x8] sm:$0xf]  ;;  %s1960_s2 = smov 126   ;;  %s1961_s9 = smov 110  }
  0x10   :  { %67 = vst [vmem:[#allocation1 + $0x10] ss:$2 sm:$0xff] %v62_v1  ;;  %v106_v8 = vld [vmem:[#allocation3 + $0x8] sm:$0xf]  ;;  %s1962_s10 = smov 109   ;;  %s1963_s11 = smov 108  }
  0x11   :  { %v131_v12 = vld [vmem:[#allocation3 + $0x8] sm:$0xf]  ;;  %s1964_s12 = smov 92   ;;  %s1965_s13 = smov 91   ;;  %v2042_v34 = vld [vmem:[#allocation3 + $0xc] sm:$0xff]  ;;  %vm103_vm0 = vcmask 244740  }
  0x12   :  { %v157_v16 = vld [vmem:[#allocation3 + $0x8] sm:$0xf]  ;;  %v285_v37 = vld [vmem:[#allocation3 + $0x14] sm:$0xf]  ;;  %s1966_s14 = smov 90   ;;  %vm76_vm1 = vcmask 240640  }
  0x13   :  { %v182_v20 = vld [vmem:[#allocation3 + $0x8] sm:$0xf]  ;;  %v301_v41 = vld [vmem:[#allocation3 + $0x14] sm:$0xf]  ;;  %vm95_vm2 = vcmask 1039360   ;;  %vm121_vm3 = vcmask 1031168  }
  0x14   :  { %v208_v24 = vld [vmem:[#allocation3 + $0x8] sm:$0xf]  ;;  %v326_v45 = vld [vmem:[#allocation3 + $0x14] sm:$0xf]  ;;  %vm147_vm4 = vcmask 900096   ;;  %vm172_vm5 = vcmask 891904  }
  0x15   :  { %v233_v28 = vld [vmem:[#allocation3 + $0x8] sm:$0xf]  ;;  %v350_v49 = vld [vmem:[#allocation3 + $0x14] sm:$0xf]  ;;  %vm198_vm6 = vcmask 883712   ;;  %vm249_vm7 = vcmask 744448  }
  0x16   :  { %v68_v3 = vld.sshfl [vmem:[#allocation1] sm:$0xff pattern:$0x75316420]  ;;  %v69_v4 = vld.sshfl [vmem:[#allocation1 + $0x8] sm:$0xff pattern:$0x75316420] }
  0x17   :  { %83 = vst [vmem:[#allocation1 + $0x1] ss:$2 sm:$0xff] %v2011_v0  ;;  %v2015_v5 = vld.sshfl [vmem:[#allocation1 + $0x10] sm:$0xff pattern:$0x75316420]  ;;  %vm223_vm8 = vcmask 752640  }
  0x18   :  { %74 = vst [vmem:[#allocation2] sm:$0xf] %v68_v3  ;;  %v259_v32 = vld [vmem:[#allocation3 + $0x8] sm:$0xf]  ;;  %v375_v53 = vld [vmem:[#allocation3 + $0x14] sm:$0xf] }
  0x19   :  { %75 = vst [vmem:[#allocation2 + $0x8] sm:$0xf] %v69_v4  ;;  %v399_v58 = vld [vmem:[#allocation3 + $0x14] sm:$0xf]  ;;  %vm274_vm9 = vcmask 736256   ;;  %vm531_vm10 = vcmask 1043456  }
  0x1a   :  { %85 = vst [vmem:[#allocation1 + $0x11] ss:$2 sm:$0xff] %v79_v2  ;;  %v424_v63 = vld [vmem:[#allocation3 + $0x14] sm:$0xf]  ;;  %vm527_vm11 = vcmask 293888   ;;  %s1968_s15 = smov [#allocation9]  }
  0x1b   :  { %77 = vst.msk [vmem:[#allocation2 + $0x10] sm:$0xf] %vm76_vm1, %v2015_v5  ;;  %v448_v3 = vld [vmem:[#allocation3 + $0x14] sm:$0xf]  ;;  %s1813_s16 = sshll.u32 %s1968_s15, 4  ;;  %s1815_s19 = sshll.u32 %s2562_s3, 4  ;;  %s1814_s16 = int_to_ptr.vmem [resolvable:$true] %s1813_s16  ;;  %s1816_s19 = int_to_ptr.hbm [resolvable:$true] %s1815_s19 }
  0x1e   :  { %v86_v6 = vld.sshfl [vmem:[#allocation1] sm:$0xff pattern:$0x75316420]  ;;  %v87_v7 = vld.sshfl [vmem:[#allocation1 + $0x8] sm:$0xff pattern:$0x75316420] }
  0x1f   :  { %89 = vrot.lane.b32.xlu0 %v86_v6, %s1959_s0  ;;  %91 = vrot.lane.b32.xlu1 %v87_v7, %s1959_s0  ;;  %109 = vst [vmem:[#allocation1] ss:$2 sm:$0xff] %v2011_v0 }
  0x21   :  { %v88_v9 = vld.sshfl [vmem:[#allocation1 + $0x10] sm:$0xff pattern:$0x75316420] }
  0x22   :  { %111 = vst [vmem:[#allocation1 + $0x10] ss:$2 sm:$0xff] %v106_v8  ;;  %93 = vrot.lane.b32.xlu2 %v88_v9, %s1959_s0 }
  0x26   :  { %v113_v10 = vld.sshfl [vmem:[#allocation1 + $0x8] sm:$0xff pattern:$0x75316420]  ;;  %v112_v11 = vld.sshfl [vmem:[#allocation1] sm:$0xff pattern:$0x75316420] }
  0x27   :  { %117 = vrot.lane.b32.xlu0 %v113_v10, %s1960_s2  ;;  %135 = vst [vmem:[#allocation1 + $0x1] ss:$2 sm:$0xff] %v2011_v0 }
  0x29   :  { %v114_v13 = vld.sshfl [vmem:[#allocation1 + $0x10] sm:$0xff pattern:$0x75316420] }
  0x2a   :  { %137 = vst [vmem:[#allocation1 + $0x11] ss:$2 sm:$0xff] %v131_v12  ;;  %115 = vrot.lane.b32.xlu2 %v112_v11, %s1960_s2  ;;  %v473_v12 = vld [vmem:[#allocation3 + $0x14] sm:$0xf] }
  0x2e   :  { %v138_v14 = vld.sshfl [vmem:[#allocation1] sm:$0xff pattern:$0x75316420]  ;;  %v139_v15 = vld.sshfl [vmem:[#allocation1 + $0x8] sm:$0xff pattern:$0x75316420] }
  0x2f   :  { %141 = vrot.lane.b32.xlu1 %v138_v14, %s1961_s9  ;;  %119 = vrot.lane.b32.xlu0 %v114_v13, %s1960_s2  ;;  %160 = vst [vmem:[#allocation1] ss:$2 sm:$0xff] %v2011_v0 }
  0x31   :  { %v140_v17 = vld.sshfl [vmem:[#allocation1 + $0x10] sm:$0xff pattern:$0x75316420] }
  0x32   :  { %162 = vst [vmem:[#allocation1 + $0x10] ss:$2 sm:$0xff] %v157_v16  ;;  %143 = vrot.lane.b32.xlu2 %v139_v15, %s1961_s9 }
  0x36   :  { %v163_v18 = vld.sshfl [vmem:[#allocation1] sm:$0xff pattern:$0x75316420]  ;;  %v164_v19 = vld.sshfl [vmem:[#allocation1 + $0x8] sm:$0xff pattern:$0x75316420] }
  0x37   :  { %145 = vrot.lane.b32.xlu1 %v140_v17, %s1961_s9  ;;  %166 = vrot.lane.b32.xlu0 %v163_v18, %s1962_s10  ;;  %186 = vst [vmem:[#allocation1 + $0x1] ss:$2 sm:$0xff] %v2011_v0 }
  0x39   :  { %v165_v21 = vld.sshfl [vmem:[#allocation1 + $0x10] sm:$0xff pattern:$0x75316420] }
  0x3a   :  { %188 = vst [vmem:[#allocation1 + $0x11] ss:$2 sm:$0xff] %v182_v20 }
  0x3e   :  { %v190_v22 = vld.sshfl [vmem:[#allocation1 + $0x8] sm:$0xff pattern:$0x75316420]  ;;  %v189_v23 = vld.sshfl [vmem:[#allocation1] sm:$0xff pattern:$0x75316420] }
  0x3f   :  { %168 = vrot.lane.b32.xlu1 %v164_v19, %s1962_s10  ;;  %194 = vrot.lane.b32.xlu0 %v190_v22, %s1963_s11  ;;  %211 = vst [vmem:[#allocation1] ss:$2 sm:$0xff] %v2011_v0 }
  0x40   :  { %192 = vrot.lane.b32.xlu2 %v189_v23, %s1963_s11 }
  0x41   :  { %v191_v25 = vld.sshfl [vmem:[#allocation1 + $0x10] sm:$0xff pattern:$0x75316420] }
  0x42   :  { %213 = vst [vmem:[#allocation1 + $0x10] ss:$2 sm:$0xff] %v208_v24 }
  0x46   :  { %v214_v26 = vld.sshfl [vmem:[#allocation1] sm:$0xff pattern:$0x75316420]  ;;  %v215_v27 = vld.sshfl [vmem:[#allocation1 + $0x8] sm:$0xff pattern:$0x75316420] }
  0x47   :  { %170 = vrot.lane.b32.xlu1 %v165_v21, %s1962_s10  ;;  %237 = vst [vmem:[#allocation1 + $0x1] ss:$2 sm:$0xff] %v2011_v0 }
  0x48   :  { %196 = vrot.lane.b32.xlu2 %v191_v25, %s1963_s11 }
  0x49   :  { %v216_v29 = vld.sshfl [vmem:[#allocation1 + $0x10] sm:$0xff pattern:$0x75316420] }
  0x4a   :  { %239 = vst [vmem:[#allocation1 + $0x11] ss:$2 sm:$0xff] %v233_v28 }
  0x4e   :  { %v240_v30 = vld.sshfl [vmem:[#allocation1] sm:$0xff pattern:$0x75316420]  ;;  %v241_v31 = vld.sshfl [vmem:[#allocation1 + $0x8] sm:$0xff pattern:$0x75316420] }
  0x4f   :  { %217 = vrot.lane.b32.xlu1 %v214_v26, %s1964_s12  ;;  %262 = vst [vmem:[#allocation1] ss:$2 sm:$0xff] %v2011_v0 }
  0x50   :  { %221 = vrot.lane.b32.xlu2 %v216_v29, %s1964_s12 }
  0x51   :  { %v242_v33 = vld.sshfl [vmem:[#allocation1 + $0x10] sm:$0xff pattern:$0x75316420] }
  0x52   :  { %247 = vrot.lane.b32.xlu0 %v242_v33, %s1965_s13  ;;  %264 = vst [vmem:[#allocation1 + $0x10] ss:$2 sm:$0xff] %v259_v32 }
  0x56   :  { %v265_v35 = vld.sshfl [vmem:[#allocation1] sm:$0xff pattern:$0x75316420]  ;;  %v266_v36 = vld.sshfl [vmem:[#allocation1 + $0x8] sm:$0xff pattern:$0x75316420] }
  0x57   :  { %219 = vrot.lane.b32.xlu1 %v215_v27, %s1964_s12  ;;  %288 = vst [vmem:[#allocation1] ss:$2 sm:$0xff] %v2042_v34 }
  0x58   :  { %243 = vrot.lane.b32.xlu2 %v240_v30, %s1965_s13 }
  0x59   :  { %v267_v38 = vld.sshfl [vmem:[#allocation1 + $0x10] sm:$0xff pattern:$0x75316420] }
  0x5a   :  { %268 = vrot.lane.b32.xlu0 %v265_v35, %s1966_s14  ;;  %290 = vst [vmem:[#allocation1 + $0x10] ss:$2 sm:$0xff] %v285_v37 }
  0x5e   :  { %v291_v39 = vld.sshfl [vmem:[#allocation1] sm:$0xff pattern:$0x75316420]  ;;  %v292_v40 = vld.sshfl [vmem:[#allocation1 + $0x8] sm:$0xff pattern:$0x75316420] }
  0x5f   :  { %305 = vst [vmem:[#allocation1 + $0x1] ss:$2 sm:$0xff] %v2042_v34  ;;  %272 = vrot.lane.b32.xlu1 %v267_v38, %s1966_s14 }
  0x60   :  { %297 = vst [vmem:[#allocation2 + $0x18] sm:$0xf] %v291_v39  ;;  %245 = vrot.lane.b32.xlu2 %v241_v31, %s1965_s13 }
  0x61   :  { %298 = vst [vmem:[#allocation2 + $0x20] sm:$0xf] %v292_v40  ;;  %v293_v42 = vld.sshfl [vmem:[#allocation1 + $0x10] sm:$0xff pattern:$0x75316420] }
  0x62   :  { %270 = vrot.lane.b32.xlu0 %v266_v36, %s1966_s14  ;;  %307 = vst [vmem:[#allocation1 + $0x11] ss:$2 sm:$0xff] %v301_v41 }
  0x63   :  { %299 = vst.msk [vmem:[#allocation2 + $0x28] sm:$0xf] %vm76_vm1, %v293_v42 }
  0x66   :  { %v2052_v43 = vld.sshfl [vmem:[#allocation1] sm:$0xff pattern:$0x75316420]  ;;  %v2054_v44 = vld.sshfl [vmem:[#allocation1 + $0x8] sm:$0xff pattern:$0x75316420] }
  0x67   :  { %329 = vst [vmem:[#allocation1] ss:$2 sm:$0xff] %v2042_v34 }
  0x69   :  { %v2057_v46 = vld.sshfl [vmem:[#allocation1 + $0x10] sm:$0xff pattern:$0x75316420] }
  0x6a   :  { %331 = vst [vmem:[#allocation1 + $0x10] ss:$2 sm:$0xff] %v326_v45 }
  0x6e   :  { %v332_v47 = vld.sshfl [vmem:[#allocation1] sm:$0xff pattern:$0x75316420]  ;;  %v333_v48 = vld.sshfl [vmem:[#allocation1 + $0x8] sm:$0xff pattern:$0x75316420] }
  0x6f   :  { %354 = vst [vmem:[#allocation1 + $0x1] ss:$2 sm:$0xff] %v2042_v34  ;;  %337 = vrot.lane.b32.xlu2 %v333_v48, %s1960_s2  ;;  %335 = vrot.lane.b32.xlu1 %v332_v47, %s1960_s2 }
  0x71   :  { %v2062_v50 = vld.sshfl [vmem:[#allocation1 + $0x10] sm:$0xff pattern:$0x75316420] }
  0x72   :  { %356 = vst [vmem:[#allocation1 + $0x11] ss:$2 sm:$0xff] %v350_v49 }
  0x76   :  { %v2064_v51 = vld.sshfl [vmem:[#allocation1] sm:$0xff pattern:$0x75316420]  ;;  %v2066_v52 = vld.sshfl [vmem:[#allocation1 + $0x8] sm:$0xff pattern:$0x75316420] }
  0x77   :  { %378 = vst [vmem:[#allocation1] ss:$2 sm:$0xff] %v2042_v34 }
  0x79   :  { %v2069_v54 = vld.sshfl [vmem:[#allocation1 + $0x10] sm:$0xff pattern:$0x75316420] }
  0x7a   :  { %380 = vst [vmem:[#allocation1 + $0x10] ss:$2 sm:$0xff] %v375_v53 }
  0x7c   :  { %v94_v55 = vpop.permute.xlu2 %93 }
  0x7d   :  { %104 = vst.msk [vmem:[#allocation2 + $0x10] sm:$0xf0] %vm103_vm0, %v94_v55 }
  0x7e   :  { %v381_v56 = vld.sshfl [vmem:[#allocation1] sm:$0xff pattern:$0x75316420]  ;;  %v382_v57 = vld.sshfl [vmem:[#allocation1 + $0x8] sm:$0xff pattern:$0x75316420] }
  0x7f   :  { %384 = vrot.lane.b32.xlu0 %v381_v56, %s1962_s10  ;;  %386 = vrot.lane.b32.xlu1 %v382_v57, %s1962_s10  ;;  %403 = vst [vmem:[#allocation1 + $0x1] ss:$2 sm:$0xff] %v2042_v34 }
  0x81   :  { %v2075_v59 = vld.sshfl [vmem:[#allocation1 + $0x10] sm:$0xff pattern:$0x75316420] }
  0x82   :  { %405 = vst [vmem:[#allocation1 + $0x11] ss:$2 sm:$0xff] %v399_v58  ;;  %v496_v58 = vld [vmem:[#allocation6] sm:$0xf] }
  0x84   :  { %v116_v62 = vpop.permute.xlu2 %115 }
  0x86   :  { %v407_v60 = vld.sshfl [vmem:[#allocation1 + $0x8] sm:$0xff pattern:$0x75316420]  ;;  %v406_v61 = vld.sshfl [vmem:[#allocation1] sm:$0xff pattern:$0x75316420] }
  0x87   :  { %411 = vrot.lane.b32.xlu0 %v407_v60, %s1963_s11  ;;  %409 = vrot.lane.b32.xlu2 %v406_v61, %s1963_s11  ;;  %427 = vst [vmem:[#allocation1] ss:$2 sm:$0xff] %v2042_v34 }
  0x89   :  { %v408_v0 = vld.sshfl [vmem:[#allocation1 + $0x10] sm:$0xff pattern:$0x75316420] }
  0x8a   :  { %429 = vst [vmem:[#allocation1 + $0x10] ss:$2 sm:$0xff] %v424_v63 }
  0x8c   :  { %v144_v4 = vpop.permute.xlu2 %143 }
  0x8e   :  { %v430_v1 = vld.sshfl [vmem:[#allocation1] sm:$0xff pattern:$0x75316420]  ;;  %v431_v2 = vld.sshfl [vmem:[#allocation1 + $0x8] sm:$0xff pattern:$0x75316420] }
  0x8f   :  { %433 = vrot.lane.b32.xlu2 %v430_v1, %s1964_s12  ;;  %435 = vrot.lane.b32.xlu0 %v431_v2, %s1964_s12  ;;  %452 = vst [vmem:[#allocation1 + $0x1] ss:$2 sm:$0xff] %v2042_v34 }
  0x91   :  { %v90_v6 = vpop.permute.xlu0 %89  ;;  %v92_v7 = vpop.permute.xlu1 %91  ;;  %v432_v8 = vld.sshfl [vmem:[#allocation1 + $0x10] sm:$0xff pattern:$0x75316420] }
  0x92   :  { %v96_v9 = vsel %vm95_vm2, %v90_v6, %v92_v7  ;;  %v97_v5 = vsel %vm95_vm2, %v92_v7, %v94_v55  ;;  %454 = vst [vmem:[#allocation1 + $0x11] ss:$2 sm:$0xff] %v448_v3  ;;  %v529_v7 = vsel %vm527_vm11, %v496_v58, 0 }
  0x93   :  { %101 = vst [vmem:[#allocation2] sm:$0xf0] %v96_v9 }
  0x94   :  { %102 = vst [vmem:[#allocation2 + $0x8] sm:$0xf0] %v97_v5 }
  0x96   :  { %v456_v10 = vld.sshfl [vmem:[#allocation1 + $0x8] sm:$0xff pattern:$0x75316420]  ;;  %v455_v11 = vld.sshfl [vmem:[#allocation1] sm:$0xff pattern:$0x75316420] }
  0x97   :  { %460 = vrot.lane.b32.xlu2 %v456_v10, %s1965_s13  ;;  %458 = vrot.lane.b32.xlu1 %v455_v11, %s1965_s13  ;;  %476 = vst [vmem:[#allocation1] ss:$2 sm:$0xff] %v2042_v34 }
  0x99   :  { %v118_v13 = vpop.permute.xlu0 %117  ;;  %v457_v14 = vld.sshfl [vmem:[#allocation1 + $0x10] sm:$0xff pattern:$0x75316420] }
  0x9a   :  { %v122_v15 = vsel %vm121_vm3, %v116_v62, %v118_v13  ;;  %v193_v16 = vpop.permute.xlu2 %192  ;;  %478 = vst [vmem:[#allocation1 + $0x10] ss:$2 sm:$0xff] %v473_v12  ;;  %v497_v61 = vld [vmem:[#allocation2] sm:$0xff] }
  0x9b   :  { %127 = vst [vmem:[#allocation2 + $0x30] sm:$0xf] %v122_v15  ;;  %v498_v6 = vld [vmem:[#allocation2 + $0x8] sm:$0xff]  ;;  %v2155_v9 = vand.u32 4294901760, %v497_v61 }
  0x9e   :  { %v480_v17 = vld.sshfl [vmem:[#allocation1 + $0x8] sm:$0xff pattern:$0x75316420]  ;;  %v479_v18 = vld.sshfl [vmem:[#allocation1] sm:$0xff pattern:$0x75316420] }
  0x9f   :  { %311 = vrot.lane.b32.xlu2 %v2052_v43, %s1959_s0  ;;  %484 = vrot.lane.b32.xlu1 %v480_v17, %s1966_s14  ;;  %v2174_v17 = vand.u32 4294901760, %v498_v6 }
  0xa0   :  { %482 = vrot.lane.b32.xlu0 %v479_v18, %s1966_s14  ;;  %v2176_v18 = vand.u32 4294901760, %v529_v7 }
  0xa1   :  { %v142_v19 = vpop.permute.xlu1 %141  ;;  %v120_v20 = vpop.permute.xlu0 %119  ;;  %v481_v34 = vld.sshfl [vmem:[#allocation1 + $0x10] sm:$0xff pattern:$0x75316420] }
  0xa2   :  { %v123_v21 = vsel %vm121_vm3, %v118_v13, %v120_v20  ;;  %129 = vst.msk [vmem:[#allocation2 + $0x40] sm:$0xf] %vm76_vm1, %v120_v20  ;;  %v148_v22 = vsel %vm147_vm4, %v142_v19, %v144_v4  ;;  %v197_v23 = vpop.permute.xlu2 %196 }
  0xa3   :  { %128 = vst [vmem:[#allocation2 + $0x38] sm:$0xf] %v123_v21 }
  0xa4   :  { %153 = vst [vmem:[#allocation2 + $0x30] sm:$0xf0] %v148_v22 }
  0xa5   :  { %206 = vst.msk [vmem:[#allocation2 + $0x70] sm:$0xf0] %vm103_vm0, %v197_v23 }
  0xa7   :  { %437 = vrot.lane.b32.xlu2 %v432_v8, %s1964_s12  ;;  %362 = vrot.lane.b32.xlu1 %v2066_v52, %s1961_s9 }
  0xa8   :  { %360 = vrot.lane.b32.xlu0 %v2064_v51, %s1961_s9 }
  0xa9   :  { %v146_v24 = vpop.permute.xlu1 %145  ;;  %v167_v25 = vpop.permute.xlu0 %166 }
  0xaa   :  { %v149_v26 = vsel %vm147_vm4, %v144_v4, %v146_v24  ;;  %155 = vst.msk [vmem:[#allocation2 + $0x40] sm:$0xf0] %vm103_vm0, %v146_v24  ;;  %v222_v27 = vpop.permute.xlu2 %221 }
  0xab   :  { %154 = vst [vmem:[#allocation2 + $0x38] sm:$0xf0] %v149_v26  ;;  %v503_v55 = vld [vmem:[#allocation2 + $0x30] sm:$0xff] }
  0xac   :  { %231 = vst.msk [vmem:[#allocation2 + $0xa0] sm:$0xf] %vm76_vm1, %v222_v27  ;;  %v2145_v63 = vand.u32 4294901760, %v503_v55 }
  0xaf   :  { %413 = vrot.lane.b32.xlu2 %v408_v0, %s1963_s11  ;;  %388 = vrot.lane.b32.xlu1 %v2075_v59, %s1962_s10 }
  0xb0   :  { %313 = vrot.lane.b32.xlu0 %v2054_v44, %s1959_s0 }
  0xb1   :  { %v169_v28 = vpop.permute.xlu1 %168  ;;  %v195_v29 = vpop.permute.xlu0 %194 }
  0xb2   :  { %v173_v30 = vsel %vm172_vm5, %v167_v25, %v169_v28  ;;  %v199_v31 = vsel %vm198_vm6, %v193_v16, %v195_v29  ;;  %v200_v32 = vsel %vm198_vm6, %v195_v29, %v197_v23  ;;  %v244_v33 = vpop.permute.xlu2 %243  ;;  %v504_v0 = vld [vmem:[#allocation2 + $0x38] sm:$0xff]  ;;  %v2172_v16 = vsub.f32 %v503_v55, %v2145_v63 }
  0xb3   :  { %178 = vst [vmem:[#allocation2 + $0x60] sm:$0xf] %v173_v30  ;;  %v2164_v13 = vand.u32 4294901760, %v504_v0  ;;  %v2189_v25 = vsub.f32 %v497_v61, %v2155_v9 }
  0xb4   :  { %204 = vst [vmem:[#allocation2 + $0x60] sm:$0xf0] %v199_v31  ;;  %v2201_v31 = vsub.f32 %v498_v6, %v2174_v17 }
  0xb5   :  { %205 = vst [vmem:[#allocation2 + $0x68] sm:$0xf0] %v200_v32  ;;  %v2196_v29 = vsub.f32 %v504_v0, %v2164_v13  ;;  %v2204_v32 = vsub.f32 %v529_v7, %v2176_v18 }
  0xb7   :  { %486 = vrot.lane.b32.xlu1 %v481_v34, %s1966_s14  ;;  %315 = vrot.lane.b32.xlu2 %v2057_v46, %s1959_s0 }
  0xb8   :  { %462 = vrot.lane.b32.xlu0 %v457_v14, %s1965_s13 }
  0xb9   :  { %v171_v35 = vpop.permute.xlu1 %170 }
  0xba   :  { %v174_v36 = vsel %vm172_vm5, %v169_v28, %v171_v35  ;;  %180 = vst.msk [vmem:[#allocation2 + $0x70] sm:$0xf] %vm76_vm1, %v171_v35  ;;  %v246_v37 = vpop.permute.xlu2 %245 }
  0xbb   :  { %179 = vst [vmem:[#allocation2 + $0x68] sm:$0xf] %v174_v36  ;;  %v250_v38 = vsel %vm249_vm7, %v244_v33, %v246_v37  ;;  %v611_v36 = vand.u32 4294901760, %v2172_v16 }
  0xbc   :  { %255 = vst [vmem:[#allocation2 + $0x90] sm:$0xf0] %v250_v38  ;;  %v617_v38 = vand.u32 4294901760, %v2189_v25 }
  0xbf   :  { %364 = vrot.lane.b32.xlu1 %v2069_v54, %s1961_s9  ;;  %v509_v54 = vld [vmem:[#allocation2 + $0x60] sm:$0xff] }
  0xc0   :  { %339 = vrot.lane.b32.xlu0 %v2062_v50, %s1960_s2  ;;  %v2140_v59 = vand.u32 4294901760, %v509_v54 }
  0xc1   :  { %v218_v39 = vpop.permute.xlu1 %217 }
  0xc2   :  { %v510_v57 = vld [vmem:[#allocation2 + $0x68] sm:$0xff]  ;;  %v2159_v10 = vsub.f32 %v509_v54, %v2140_v59 }
  0xc3   :  { %v2151_v4 = vand.u32 4294901760, %v510_v57 }
  0xc4   :  { %v248_v40 = vpop.permute.xlu0 %247  ;;  %v605_v28 = vand.u32 4294901760, %v2159_v10 }
  0xc5   :  { %257 = vst.msk [vmem:[#allocation2 + $0xa0] sm:$0xf0] %vm103_vm0, %v248_v40  ;;  %v251_v41 = vsel %vm249_vm7, %v246_v37, %v248_v40  ;;  %v2183_v22 = vsub.f32 %v510_v57, %v2151_v4 }
  0xc6   :  { %256 = vst [vmem:[#allocation2 + $0x98] sm:$0xf0] %v251_v41  ;;  %v606_v41 = vsub.f32 %v2159_v10, %v605_v28 }
  0xc7   :  { %v803_v35 = vand.u32 4294901760, %v2183_v22 }
  0xc9   :  { %v220_v42 = vpop.permute.xlu1 %219  ;;  %v2134_v51 = vpop.permute.xlu2 %337 }
  0xca   :  { %v224_v43 = vsel %vm223_vm8, %v218_v39, %v220_v42  ;;  %v225_v44 = vsel %vm223_vm8, %v220_v42, %v222_v27  ;;  %v809_v42 = vand.u32 4294901760, %v2196_v29 }
  0xcb   :  { %229 = vst [vmem:[#allocation2 + $0x90] sm:$0xf] %v224_v43 }
  0xcc   :  { %v269_v45 = vpop.permute.xlu0 %268  ;;  %230 = vst [vmem:[#allocation2 + $0x98] sm:$0xf] %v225_v44  ;;  %v2225_v44 = vand.u32 4294901760, %v2204_v32 }
  0xce   :  { %v574_v54 = vsub.f32 %v2204_v32, %v2225_v44 }
  0xd1   :  { %v273_v46 = vpop.permute.xlu1 %272 }
  0xd2   :  { %282 = vst.msk [vmem:[#allocation2 + $0xd0] sm:$0xf] %vm76_vm1, %v273_v46  ;;  %v515_v50 = vld [vmem:[#allocation2 + $0x90] sm:$0xff] }
  0xd3   :  { %v516_v52 = vld [vmem:[#allocation2 + $0x98] sm:$0xff]  ;;  %v2136_v53 = vand.u32 4294901760, %v515_v50 }
  0xd4   :  { %v271_v47 = vpop.permute.xlu0 %270  ;;  %v2138_v56 = vand.u32 4294901760, %v516_v52 }
  0xd5   :  { %v275_v48 = vsel %vm274_vm9, %v269_v45, %v271_v47  ;;  %v276_v49 = vsel %vm274_vm9, %v271_v47, %v273_v46  ;;  %v2143_v60 = vsub.f32 %v515_v50, %v2136_v53  ;;  %v804_v46 = vsub.f32 %v2183_v22, %v803_v35 }
  0xd6   :  { %280 = vst [vmem:[#allocation2 + $0xc0] sm:$0xf] %v275_v48  ;;  %v2149_v3 = vsub.f32 %v516_v52, %v2138_v56  ;;  %v612_v47 = vsub.f32 %v2172_v16, %v611_v36  ;;  %v815_v48 = vand.u32 4294901760, %v2201_v31  ;;  %v810_v50 = vsub.f32 %v2196_v29, %v809_v42 }
  0xd7   :  { %281 = vst [vmem:[#allocation2 + $0xc8] sm:$0xf] %v276_v49  ;;  %v599_v12 = vand.u32 4294901760, %v2143_v60  ;;  %v607_v49 = vand.u32 4294901760, %v606_v41  ;;  %v618_v52 = vsub.f32 %v2189_v25, %v617_v38  ;;  %v805_v55 = vand.u32 4294901760, %v804_v46 }
  0xd8   :  { %v797_v21 = vand.u32 4294901760, %v2149_v3  ;;  %v613_v57 = vand.u32 4294901760, %v612_v47  ;;  %v816_v58 = vsub.f32 %v2201_v31, %v815_v48 }
  0xd9   :  { %v600_v27 = vsub.f32 %v2143_v60, %v599_v12  ;;  %v619_v61 = vand.u32 4294901760, %v618_v52  ;;  %v523_v7 = vld [vmem:[#allocation2 + $0xd0] sm:$0xf] }
  0xda   :  { %v798_v34 = vsub.f32 %v2149_v3, %v797_v21 }
  0xdb   :  { %v601_v40 = vand.u32 4294901760, %v600_v27 }
  0xdc   :  { %v799_v45 = vand.u32 4294901760, %v798_v34 }
  0xdd   :  { %v521_v62 = vld [vmem:[#allocation2 + $0xc0] sm:$0xf] }
  0xde   :  { %v533_v1 = vsel %vm531_vm10, %v521_v62, 0  ;;  %v522_v2 = vld [vmem:[#allocation2 + $0xc8] sm:$0xf]  ;;  %v2247_v62 = vand.u32 4294901760, %v574_v54 }
  0xdf   :  { %v2153_v8 = vand.u32 4294901760, %v533_v1  ;;  %v536_v5 = vsel %vm531_vm10, %v522_v2, 0  ;;  %v817_v2 = vand.u32 4294901760, %v816_v58 }
  0xe0   :  { %v2161_v11 = vand.u32 4294901760, %v536_v5 }
  0xe1   :  { %562 = vmatpush.msra.mxu0 %v2153_v8  ;;  %670 = vmatpush.msra.mxu3 %v2153_v8  ;;  %v592_v14 = vsub.f32 %v533_v1, %v2153_v8  ;;  %v2169_v15 = vpop.permute.xlu2 %409  ;;  %v336_v19 = vpop.permute.xlu1 %335 }
  0xe2   :  { %v2179_v20 = vsub.f32 %v536_v5, %v2161_v11  ;;  %v341_v23 = vsel %vm121_vm3, %v336_v19, %v2134_v51  ;;  %v511_v19 = vld [vmem:[#allocation2 + $0x70] sm:$0xff] }
  0xe3   :  { %564 = vmatpush.msra.mxu0 %v2136_v53  ;;  %639 = vmatpush.msra.mxu2 %v592_v14  ;;  %v593_v24 = vand.u32 4294901760, %v592_v14  ;;  %346 = vst [vmem:[#allocation2 + $0x48] sm:$0xf] %v341_v23 }
  0xe4   :  { %672 = vmatpush.msra.mxu3 %v2136_v53  ;;  %v791_v26 = vand.u32 4294901760, %v2179_v20 }
  0xe5   :  { %566 = vmatpush.msra.mxu0 %v2140_v59  ;;  %642 = vmatpush.msra.mxu2 %v2143_v60  ;;  %v594_v30 = vsub.f32 %v592_v14, %v593_v24  ;;  %v811_v60 = vand.u32 4294901760, %v810_v50 }
  0xe6   :  { %674 = vmatpush.msra.mxu3 %v2140_v59  ;;  %v792_v33 = vsub.f32 %v2179_v20, %v791_v26 }
  0xe7   :  { %568 = vmatpush.msra.mxu0 %v2145_v63  ;;  %645 = vmatpush.msra.mxu2 %v2159_v10  ;;  %v595_v37 = vand.u32 4294901760, %v594_v30  ;;  %v539_v10 = vsel %vm531_vm10, %v523_v7, 0 }
  0xe8   :  { %676 = vmatpush.msra.mxu3 %v2145_v63  ;;  %v793_v39 = vand.u32 4294901760, %v792_v33 }
  0xe9   :  { %570 = vmatpush.msra.mxu0 %v2155_v9  ;;  %596 = vmatpush.msra.mxu1 %v595_v37  ;;  %v2222_v43 = vpop.permute.xlu2 %433 }
  0xea   :  { %648 = vmatpush.msra.mxu2 %v2172_v16  ;;  %678 = vmatpush.msra.mxu3 %v2155_v9  ;;  %v517_v16 = vld [vmem:[#allocation2 + $0xa0] sm:$0xff] }
  0xeb   :  { %700 = vmatpush.msrb.mxu0 %v593_v24  ;;  %602 = vmatpush.msra.mxu1 %v601_v40 }
  0xec   :  { %794 = vmatpush.msrb.mxu3 %v793_v39  ;;  %651 = vmatpush.msra.mxu2 %v2189_v25 }
  0xed   :  { %704 = vmatpush.msrb.mxu0 %v599_v12  ;;  %608 = vmatpush.msra.mxu1 %v607_v49 }
  0xee   :  { %760 = vmatpush.msrb.mxu2 %v2161_v11  ;;  %800 = vmatpush.msrb.mxu3 %v799_v45 }
  0xef   :  { %708 = vmatpush.msrb.mxu0 %v605_v28  ;;  %614 = vmatpush.msra.mxu1 %v613_v57 }
  0xf0   :  { %762 = vmatpush.msrb.mxu2 %v2138_v56  ;;  %806 = vmatpush.msrb.mxu3 %v805_v55 }
  0xf1   :  { %712 = vmatpush.msrb.mxu0 %v611_v36  ;;  %v385_v0 = vpop.permute.xlu0 %384  ;;  %v2249_v1 = vpop.permute.xlu2 %460  ;;  %620 = vmatpush.msra.mxu1 %v619_v61 }
  0xf2   :  { %764 = vmatpush.msrb.mxu2 %v2151_v4  ;;  %812 = vmatpush.msrb.mxu3 %v811_v60  ;;  %v2251_v6 = vpop.permute.xlu1 %386 }
  0xf3   :  { %716 = vmatpush.msrb.mxu0 %v617_v38  ;;  %734 = vmatpush.msrb.mxu1 %v2153_v8  ;;  %v390_v5 = vsel %vm172_vm5, %v385_v0, %v2251_v6  ;;  %v2266_v8 = vand.u32 4294901760, %v539_v10 }
  0xf4   :  { %766 = vmatpush.msrb.mxu2 %v2164_v13  ;;  %818 = vmatpush.msrb.mxu3 %v817_v2  ;;  %395 = vst [vmem:[#allocation2 + $0x78] sm:$0xf] %v390_v5 }
  0xf5   :  { %576 = vmatmul.f32.vlgmr.msra.gmra.mxu0 %v2247_v62  ;;  %682 = vmatmul.f32.vlgmr.msra.gmra.mxu3 %v2225_v44 }
  0xf6   :  { %837 = vmatpush.msra.mxu0 %v2179_v20  ;;  %932 = vmatpush.msra.mxu3 %v2161_v11  ;;  %v2285_v20 = vand.u32 4294901760, %v517_v16 }
  0xf7   :  { %736 = vmatpush.msrb.mxu1 %v2136_v53  ;;  %768 = vmatpush.msrb.mxu2 %v2174_v17 }
  0xf8   :  { %654 = vmatmul.f32.vlgmr.msra.gmra.mxu2 %v2204_v32  ;;  %840 = vmatpush.msra.mxu0 %v2149_v3  ;;  %v505_v3 = vld [vmem:[#allocation2 + $0x40] sm:$0xff] }
  0xf9   :  { %898 = vmatpush.msra.mxu2 %v791_v26  ;;  %934 = vmatpush.msra.mxu3 %v2138_v56  ;;  %v2271_v12 = vpop.permute.xlu0 %411  ;;  %v2273_v14 = vpop.permute.xlu2 %311 }
  0xfa   :  { %738 = vmatpush.msrb.mxu1 %v2140_v59  ;;  %843 = vmatpush.msra.mxu0 %v2183_v22  ;;  %v415_v53 = vsel %vm198_vm6, %v2169_v15, %v2271_v12  ;;  %v2288_v59 = vsub.f32 %v539_v10, %v2266_v8  ;;  %v2295_v15 = vand.u32 4294901760, %v511_v19  ;;  %v2305_v22 = vand.u32 4294901760, %v505_v3 }
  0xfb   :  { %902 = vmatpush.msra.mxu2 %v797_v21  ;;  %936 = vmatpush.msra.mxu3 %v2151_v4  ;;  %420 = vst [vmem:[#allocation2 + $0x78] sm:$0xf0] %v415_v53  ;;  %v2303_v21 = vsub.f32 %v517_v16, %v2285_v20 }
  0xfc   :  { %740 = vmatpush.msrb.mxu1 %v2145_v63  ;;  %846 = vmatpush.msra.mxu0 %v2196_v29  ;;  %v499_v63 = vld [vmem:[#allocation2 + $0x10] sm:$0xff]  ;;  %v1006_v29 = vsub.f32 %v505_v3, %v2305_v22 }
  0xfd   :  { %906 = vmatpush.msra.mxu2 %v803_v35  ;;  %938 = vmatpush.msra.mxu3 %v2164_v13  ;;  %v2310_v24 = vand.u32 4294901760, %v499_v63  ;;  %v995_v30 = vand.u32 4294901760, %v2303_v21 }
  0xfe   :  { %742 = vmatpush.msrb.mxu1 %v2155_v9  ;;  %849 = vmatpush.msra.mxu0 %v2201_v31  ;;  %v989_v9 = vand.u32 4294901760, %v2288_v59  ;;  %v1007_v35 = vand.u32 4294901760, %v1006_v29 }
  0xff   :  { %622 = vmatmul.f32.vlgmr.msra.gmra.mxu1 %v2176_v18  ;;  %910 = vmatpush.msra.mxu2 %v809_v42  ;;  %v996_v34 = vsub.f32 %v2303_v21, %v995_v30 }
 0x100   :  { %868 = vmatpush.msra.mxu1 %v2161_v11  ;;  %940 = vmatpush.msra.mxu3 %v2174_v17  ;;  %v1000_v11 = vsub.f32 %v511_v19, %v2295_v15  ;;  %v990_v28 = vsub.f32 %v2288_v59, %v989_v9 }
 0x101   :  { %718 = vmatmul.f32.vlgmr.msrb.gmra.mxu0 %v2176_v18  ;;  %820 = vmatmul.f32.vlgmr.msrb.gmra.mxu3 %v2176_v18  ;;  %v438_v23 = vpop.permute.xlu2 %437  ;;  %v436_v25 = vpop.permute.xlu0 %435  ;;  %v997_v40 = vand.u32 4294901760, %v996_v34 }
 0x102   :  { %958 = vmatpush.msrb.mxu0 %v2266_v8  ;;  %1066 = vmatpush.msrb.mxu3 %v2266_v8  ;;  %446 = vst.msk [vmem:[#allocation2 + $0xb8] sm:$0xf] %vm76_vm1, %v438_v23  ;;  %v439_v26 = vsel %vm223_vm8, %v2222_v43, %v436_v25  ;;  %v440_v27 = vsel %vm223_vm8, %v436_v25, %v438_v23  ;;  %v1001_v31 = vand.u32 4294901760, %v1000_v11  ;;  %v991_v33 = vand.u32 4294901760, %v990_v28  ;;  %v512_v54 = vld [vmem:[#allocation2 + $0x78] sm:$0xff] }
 0x103   :  { %870 = vmatpush.msra.mxu1 %v2138_v56  ;;  %914 = vmatpush.msra.mxu2 %v815_v48  ;;  %444 = vst [vmem:[#allocation2 + $0xa8] sm:$0xf] %v439_v26  ;;  %v1012_v56 = vsub.f32 %v499_v63, %v2310_v24  ;;  %v2366_v57 = vand.u32 4294901760, %v512_v54 }
 0x104   :  { %774 = vmatmul.f32.vlgmr.msrb.gmra.mxu2 %v2247_v62  ;;  %960 = vmatpush.msrb.mxu0 %v2285_v20  ;;  %445 = vst [vmem:[#allocation2 + $0xb0] sm:$0xf] %v440_v27  ;;  %v1002_v38 = vsub.f32 %v1000_v11, %v1001_v31 }
 0x105   :  { %1035 = vmatpush.msrb.mxu2 %v2288_v59  ;;  %1068 = vmatpush.msrb.mxu3 %v2285_v20  ;;  %v1013_v37 = vand.u32 4294901760, %v1012_v56  ;;  %v2381_v5 = vsub.f32 %v512_v54, %v2366_v57 }
 0x106   :  { %872 = vmatpush.msra.mxu1 %v2151_v4  ;;  %962 = vmatpush.msrb.mxu0 %v2295_v15  ;;  %v1003_v41 = vand.u32 4294901760, %v1002_v38 }
 0x107   :  { %1038 = vmatpush.msrb.mxu2 %v2303_v21  ;;  %1070 = vmatpush.msrb.mxu3 %v2295_v15  ;;  %v1014_v42 = vsub.f32 %v1012_v56, %v1013_v37  ;;  %v1199_v53 = vand.u32 4294901760, %v2381_v5 }
 0x108   :  { %874 = vmatpush.msra.mxu1 %v2164_v13  ;;  %964 = vmatpush.msrb.mxu0 %v2305_v22 }
 0x109   :  { %1041 = vmatpush.msrb.mxu2 %v1000_v11  ;;  %1072 = vmatpush.msrb.mxu3 %v2305_v22  ;;  %v414_v36 = vpop.permute.xlu2 %413  ;;  %v459_v4 = vpop.permute.xlu1 %458  ;;  %v1015_v47 = vand.u32 4294901760, %v1014_v42 }
 0x10a   :  { %876 = vmatpush.msra.mxu1 %v2174_v17  ;;  %966 = vmatpush.msrb.mxu0 %v2310_v24  ;;  %v416_v13 = vsel %vm198_vm6, %v2271_v12, %v414_v36  ;;  %422 = vst.msk [vmem:[#allocation2 + $0x88] sm:$0xf0] %vm103_vm0, %v414_v36  ;;  %v464_v39 = vsel %vm249_vm7, %v459_v4, %v2249_v1 }
 0x10b   :  { %744 = vmatmul.f32.vlgmr.msrb.gmra.mxu1 %v2176_v18  ;;  %1044 = vmatpush.msrb.mxu2 %v1006_v29  ;;  %421 = vst [vmem:[#allocation2 + $0x80] sm:$0xf0] %v416_v13  ;;  %v1008_v17 = vsub.f32 %v1006_v29, %v1007_v35 }
 0x10c   :  { %992 = vmatpush.msrb.mxu1 %v991_v33  ;;  %1074 = vmatpush.msrb.mxu3 %v2310_v24  ;;  %469 = vst [vmem:[#allocation2 + $0xa8] sm:$0xf0] %v464_v39 }
 0x10d   :  { %852 = vmatmul.f32.vlgmr.msra.gmra.mxu0 %v2204_v32  ;;  %1047 = vmatpush.msrb.mxu2 %v1012_v56  ;;  %v1009_v43 = vand.u32 4294901760, %v1008_v17 }
 0x10e   :  { %1096 = vmatpush.msra.mxu0 %v989_v9  ;;  %998 = vmatpush.msrb.mxu1 %v997_v40 }
 0x10f   :  { %916 = vmatmul.f32.vlgmr.msra.gmra.mxu2 %v2176_v18  ;;  %942 = vmatmul.f32.vlgmr.msra.gmra.mxu3 %v2176_v18 }
 0x110   :  { %1100 = vmatpush.msra.mxu0 %v995_v30  ;;  %1004 = vmatpush.msrb.mxu1 %v1003_v41 }
 0x111   :  { %v2350_v45 = vpop.permute.xlu1 %484  ;;  %v316_v46 = vpop.permute.xlu2 %315 }
 0x112   :  { %1104 = vmatpush.msra.mxu0 %v1001_v31  ;;  %1010 = vmatpush.msrb.mxu1 %v1009_v43  ;;  %v483_v48 = vpop.permute.xlu0 %482  ;;  %324 = vst.msk [vmem:[#allocation2 + $0x28] sm:$0xf0] %vm103_vm0, %v316_v46 }
 0x113   :  { %880 = vmatmul.f32.vlgmr.msra.gmra.mxu1 %v2225_v44  ;;  %v488_v49 = vsel %vm274_vm9, %v483_v48, %v2350_v45  ;;  %v518_v50 = vld [vmem:[#allocation2 + $0xa8] sm:$0xff] }
 0x114   :  { %1108 = vmatpush.msra.mxu0 %v1007_v35  ;;  %1016 = vmatpush.msrb.mxu1 %v1015_v47  ;;  %493 = vst [vmem:[#allocation2 + $0xd8] sm:$0xf] %v488_v49  ;;  %v2358_v52 = vand.u32 4294901760, %v518_v50 }
 0x115   :  { %972 = vmatmul.f32.vlgmr.msrb.gmra.mxu0 %v2247_v62 }
 0x116   :  { %1130 = vmatpush.msra.mxu1 %v2266_v8  ;;  %1112 = vmatpush.msra.mxu0 %v1013_v37  ;;  %v2369_v60 = vsub.f32 %v518_v50, %v2358_v52 }
 0x117   :  { %1050 = vmatmul.f32.vlgmr.msrb.gmra.mxu2 %v2204_v32  ;;  %1078 = vmatmul.f32.vlgmr.msrb.gmra.mxu3 %v2225_v44 }
 0x118   :  { %1132 = vmatpush.msra.mxu1 %v2285_v20  ;;  %v1193_v10 = vand.u32 4294901760, %v2369_v60 }
 0x119   :  { %v2364_v55 = vpop.permute.xlu1 %362 }
 0x11a   :  { %1134 = vmatpush.msra.mxu1 %v2295_v15  ;;  %v361_v58 = vpop.permute.xlu0 %360  ;;  %v1194_v59 = vsub.f32 %v2369_v60, %v1193_v10 }
 0x11b   :  { %v366_v61 = vsel %vm147_vm4, %v361_v58, %v2364_v55  ;;  %v524_v0 = vld [vmem:[#allocation2 + $0xd8] sm:$0xf]  ;;  %1018 = vmatmul.f32.vlgmr.msrb.gmra.mxu1 %v2176_v18 }
 0x11c   :  { %1136 = vmatpush.msra.mxu1 %v2305_v22  ;;  %371 = vst [vmem:[#allocation2 + $0x48] sm:$0xf0] %v366_v61  ;;  %v542_v2 = vsel %vm531_vm10, %v524_v0, 0  ;;  %v1195_v23 = vand.u32 4294901760, %v1194_v59 }
 0x11d   :  { %v2377_v7 = vand.u32 4294901760, %v542_v2  ;;  %1114 = vmatmul.f32.vlgmr.msra.gmra.mxu0 %v2176_v18 }
 0x11e   :  { %1138 = vmatpush.msra.mxu1 %v2310_v24 }
 0x11f   :  { %1156 = vmatpush.msra.mxu2 %v2377_v7  ;;  %v1186_v8 = vsub.f32 %v542_v2, %v2377_v7 }
 0x120   :  { %1264 = vmatpush.msrb.mxu1 %v2377_v7 }
 0x121   :  { %1158 = vmatpush.msra.mxu2 %v2358_v52  ;;  %1233 = vmatpush.msrb.mxu0 %v1186_v8  ;;  %v389_v12 = vpop.permute.xlu1 %388  ;;  %v1187_v16 = vand.u32 4294901760, %v1186_v8 }
 0x122   :  { %1266 = vmatpush.msrb.mxu1 %v2358_v52  ;;  %v391_v19 = vsel %vm172_vm5, %v2251_v6, %v389_v12  ;;  %397 = vst.msk [vmem:[#allocation2 + $0x88] sm:$0xf] %vm76_vm1, %v389_v12  ;;  %v314_v20 = vpop.permute.xlu0 %313 }
 0x123   :  { %396 = vst [vmem:[#allocation2 + $0x80] sm:$0xf] %v391_v19  ;;  %v317_v3 = vsel %vm95_vm2, %v2273_v14, %v314_v20  ;;  %v318_v15 = vsel %vm95_vm2, %v314_v20, %v316_v46  ;;  %1160 = vmatpush.msra.mxu2 %v2366_v57  ;;  %1236 = vmatpush.msrb.mxu0 %v2369_v60  ;;  %v506_v63 = vld [vmem:[#allocation2 + $0x48] sm:$0xff] }
 0x124   :  { %v1188_v21 = vsub.f32 %v1186_v8, %v1187_v16  ;;  %322 = vst [vmem:[#allocation2 + $0x18] sm:$0xf0] %v317_v3  ;;  %1268 = vmatpush.msrb.mxu1 %v2366_v57  ;;  %v2400_v6 = vand.u32 4294901760, %v506_v63  ;;  %v1200_v14 = vsub.f32 %v2381_v5, %v1199_v53 }
 0x125   :  { %323 = vst [vmem:[#allocation2 + $0x20] sm:$0xf0] %v318_v15  ;;  %1140 = vmatmul.f32.vlgmr.msra.gmra.mxu1 %v2176_v18  ;;  %1239 = vmatpush.msrb.mxu0 %v2381_v5 }
 0x126   :  { %v1189_v22 = vand.u32 4294901760, %v1188_v21  ;;  %1162 = vmatpush.msra.mxu2 %v2400_v6  ;;  %1270 = vmatpush.msrb.mxu1 %v2400_v6  ;;  %v1204_v9 = vsub.f32 %v506_v63, %v2400_v6  ;;  %v1201_v11 = vand.u32 4294901760, %v1200_v14  ;;  %v502_v21 = vld [vmem:[#allocation2 + $0x28] sm:$0xff] }
 0x128   :  { %1190 = vmatpush.msra.mxu3 %v1189_v22  ;;  %1242 = vmatpush.msrb.mxu0 %v1204_v9  ;;  %v1205_v24 = vand.u32 4294901760, %v1204_v9 }
 0x129   :  { %v487_v25 = vpop.permute.xlu1 %486  ;;  %v514_v8 = vld [vmem:[#allocation2 + $0x88] sm:$0xff] }
 0x12a   :  { %1196 = vmatpush.msra.mxu3 %v1195_v23  ;;  %v489_v26 = vsel %vm274_vm9, %v2350_v45, %v487_v25  ;;  %495 = vst.msk [vmem:[#allocation2 + $0xe8] sm:$0xf] %vm76_vm1, %v487_v25  ;;  %v463_v27 = vpop.permute.xlu0 %462  ;;  %v1206_v28 = vsub.f32 %v1204_v9, %v1205_v24  ;;  %v513_v34 = vld [vmem:[#allocation2 + $0x80] sm:$0xff]  ;;  %v2470_v20 = vand.u32 4294901760, %v514_v8 }
 0x12b   :  { %494 = vst [vmem:[#allocation2 + $0xe0] sm:$0xf] %v489_v26  ;;  %v465_v29 = vsel %vm249_vm7, %v2249_v1, %v463_v27  ;;  %v500_v30 = vld [vmem:[#allocation2 + $0x18] sm:$0xff]  ;;  %v2426_v13 = vand.u32 4294901760, %v513_v34 }
 0x12c   :  { %1202 = vmatpush.msra.mxu3 %v1201_v11  ;;  %470 = vst [vmem:[#allocation2 + $0xb0] sm:$0xf0] %v465_v29  ;;  %v2415_v56 = vand.u32 4294901760, %v500_v30  ;;  %v1207_v31 = vand.u32 4294901760, %v1206_v28  ;;  %v501_v45 = vld [vmem:[#allocation2 + $0x20] sm:$0xff]  ;;  %v2480_v11 = vand.u32 4294901760, %v502_v21 }
 0x12d   :  { %471 = vst.msk [vmem:[#allocation2 + $0xb8] sm:$0xf0] %vm103_vm0, %v463_v27  ;;  %v2443_v48 = vsub.f32 %v513_v34, %v2426_v13  ;;  %v2446_v49 = vand.u32 4294901760, %v501_v45 }
 0x12e   :  { %1164 = vmatpush.msra.mxu2 %v2415_v56  ;;  %1208 = vmatpush.msra.mxu3 %v1207_v31  ;;  %v1210_v33 = vsub.f32 %v500_v30, %v2415_v56 }
 0x12f   :  { %1272 = vmatpush.msrb.mxu1 %v2415_v56  ;;  %1170 = vmatmul.f32.vlgmr.msra.gmra.mxu2 %v2247_v62  ;;  %v1397_v60 = vand.u32 4294901760, %v2443_v48  ;;  %v1408_v2 = vsub.f32 %v501_v45, %v2446_v49 }
 0x130   :  { %1294 = vmatpush.msrb.mxu2 %v1187_v16  ;;  %1245 = vmatpush.msrb.mxu0 %v1210_v33  ;;  %v1211_v1 = vand.u32 4294901760, %v1210_v33 }
 0x131   :  { %v365_v35 = vpop.permute.xlu1 %364  ;;  %1248 = vmatmul.f32.vlgmr.msrb.gmra.mxu0 %v2204_v32  ;;  %1276 = vmatmul.f32.vlgmr.msrb.gmra.mxu1 %v2225_v44  ;;  %v526_v46 = vld [vmem:[#allocation2 + $0xe8] sm:$0xf]  ;;  %v1398_v16 = vsub.f32 %v2443_v48, %v1397_v60  ;;  %v1409_v59 = vand.u32 4294901760, %v1408_v2 }
 0x132   :  { %1298 = vmatpush.msrb.mxu2 %v1193_v10  ;;  %v367_v36 = vsel %vm147_vm4, %v2364_v55, %v365_v35  ;;  %373 = vst.msk [vmem:[#allocation2 + $0x58] sm:$0xf0] %vm103_vm0, %v365_v35  ;;  %v340_v4 = vpop.permute.xlu0 %339  ;;  %v1212_v37 = vsub.f32 %v1210_v33, %v1211_v1  ;;  %v525_v38 = vld [vmem:[#allocation2 + $0xe0] sm:$0xf]  ;;  %v548_v55 = vsel %vm531_vm10, %v526_v46, 0 }
 0x133   :  { %372 = vst [vmem:[#allocation2 + $0x50] sm:$0xf0] %v367_v36  ;;  %v342_v39 = vsel %vm121_vm3, %v2134_v51, %v340_v4  ;;  %v545_v40 = vsel %vm531_vm10, %v525_v38, 0  ;;  %v519_v17 = vld [vmem:[#allocation2 + $0xb0] sm:$0xff]  ;;  %v1399_v22 = vand.u32 4294901760, %v1398_v16  ;;  %v1410_v9 = vsub.f32 %v1408_v2, %v1409_v59 }
 0x134   :  { %1302 = vmatpush.msrb.mxu2 %v1199_v53  ;;  %347 = vst [vmem:[#allocation2 + $0x50] sm:$0xf] %v342_v39  ;;  %v1213_v41 = vand.u32 4294901760, %v1212_v37  ;;  %v2434_v42 = vand.u32 4294901760, %v545_v40  ;;  %v2436_v43 = vand.u32 4294901760, %v519_v17  ;;  %v520_v61 = vld [vmem:[#allocation2 + $0xb8] sm:$0xff] }
 0x135   :  { %348 = vst.msk [vmem:[#allocation2 + $0x58] sm:$0xf] %vm76_vm1, %v340_v4  ;;  %v2463_v12 = vand.u32 4294901760, %v520_v61  ;;  %v1411_v28 = vand.u32 4294901760, %v1410_v9  ;;  %vm1772_vm3 = vcmask 3072  }
 0x136   :  { %1306 = vmatpush.msrb.mxu2 %v1205_v24  ;;  %1214 = vmatpush.msra.mxu3 %v1213_v41  ;;  %v1384_v51 = vsub.f32 %v545_v40, %v2434_v42  ;;  %v1390_v47 = vsub.f32 %v519_v17, %v2436_v43  ;;  %v1594_v24 = vsub.f32 %v514_v8, %v2470_v20 }
 0x137   :  { %1354 = vmatpush.msra.mxu0 %v2434_v42  ;;  %1216 = vmatmul.f32.vlgmr.msra.gmra.mxu3 %v2176_v18 }
 0x138   :  { %1310 = vmatpush.msrb.mxu2 %v1211_v1  ;;  %1328 = vmatpush.msrb.mxu3 %v2377_v7  ;;  %v1385_v50 = vand.u32 4294901760, %v1384_v51  ;;  %v1391_v54 = vand.u32 4294901760, %v1390_v47  ;;  %v2457_v7 = vand.u32 4294901760, %v548_v55  ;;  %v1595_v30 = vand.u32 4294901760, %v1594_v24 }
 0x139   :  { %1356 = vmatpush.msra.mxu0 %v2436_v43  ;;  %1312 = vmatmul.f32.vlgmr.msrb.gmra.mxu2 %v2176_v18 }
 0x13a   :  { %1330 = vmatpush.msrb.mxu3 %v2358_v52  ;;  %1431 = vmatpush.msra.mxu2 %v1384_v51  ;;  %v1386_v58 = vsub.f32 %v1384_v51, %v1385_v50  ;;  %v1392_v10 = vsub.f32 %v1390_v47, %v1391_v54  ;;  %v1582_v19 = vsub.f32 %v548_v55, %v2457_v7  ;;  %v1967_v51 = vmov 0  }
 0x13b   :  { %1358 = vmatpush.msra.mxu0 %v2426_v13  ;;  %v507_v0 = vld [vmem:[#allocation2 + $0x50] sm:$0xff]  ;;  %v1596_v1 = vsub.f32 %v1594_v24, %v1595_v30 }
 0x13c   :  { %1332 = vmatpush.msrb.mxu3 %v2366_v57  ;;  %1434 = vmatpush.msra.mxu2 %v1390_v47  ;;  %v2459_v5 = vand.u32 4294901760, %v507_v0  ;;  %v1387_v52 = vand.u32 4294901760, %v1386_v58  ;;  %v508_v53 = vld [vmem:[#allocation2 + $0x58] sm:$0xff]  ;;  %v1393_v3 = vand.u32 4294901760, %v1392_v10  ;;  %v1583_v23 = vand.u32 4294901760, %v1582_v19 }
 0x13d   :  { %v2475_v63 = vand.u32 4294901760, %v508_v53  ;;  %v1597_v37 = vand.u32 4294901760, %v1596_v1 }
 0x13e   :  { %1334 = vmatpush.msrb.mxu3 %v2400_v6  ;;  %1437 = vmatpush.msra.mxu2 %v2443_v48  ;;  %v1402_v57 = vsub.f32 %v507_v0, %v2459_v5  ;;  %v1588_v6 = vsub.f32 %v520_v61, %v2463_v12  ;;  %v1584_v29 = vsub.f32 %v1582_v19, %v1583_v23 }
 0x13f   :  { %1360 = vmatpush.msra.mxu0 %v2459_v5  ;;  %1388 = vmatpush.msra.mxu1 %v1387_v52  ;;  %v1600_v27 = vsub.f32 %v508_v53, %v2475_v63 }
 0x140   :  { %1336 = vmatpush.msrb.mxu3 %v2415_v56  ;;  %v1403_v15 = vand.u32 4294901760, %v1402_v57  ;;  %1440 = vmatpush.msra.mxu2 %v1402_v57  ;;  %v1589_v26 = vand.u32 4294901760, %v1588_v6  ;;  %v1606_v56 = vsub.f32 %v502_v21, %v2480_v11  ;;  %v1585_v34 = vand.u32 4294901760, %v1584_v29 }
 0x141   :  { %1338 = vmatmul.f32.vlgmr.msrb.gmra.mxu3 %v2176_v18  ;;  %1362 = vmatpush.msra.mxu0 %v2446_v49  ;;  %v1601_v33 = vand.u32 4294901760, %v1600_v27 }
 0x142   :  { %1462 = vmatpush.msra.mxu3 %v2434_v42  ;;  %1394 = vmatpush.msra.mxu1 %v1393_v3  ;;  %v1404_v14 = vsub.f32 %v1402_v57, %v1403_v15  ;;  %v1590_v31 = vsub.f32 %v1588_v6, %v1589_v26  ;;  %v1607_v35 = vand.u32 4294901760, %v1606_v56 }
 0x143   :  { %1492 = vmatpush.msrb.mxu0 %v1385_v50  ;;  %1443 = vmatpush.msra.mxu2 %v1408_v2  ;;  %v1602_v4 = vsub.f32 %v1600_v27, %v1601_v33 }
 0x144   :  { %1464 = vmatpush.msra.mxu3 %v2436_v43  ;;  %1400 = vmatpush.msra.mxu1 %v1399_v22  ;;  %v1405_v25 = vand.u32 4294901760, %v1404_v14  ;;  %v1591_v36 = vand.u32 4294901760, %v1590_v31  ;;  %v1608_v38 = vsub.f32 %v1606_v56, %v1607_v35 }
 0x145   :  { %1496 = vmatpush.msrb.mxu0 %v1391_v54  ;;  %1552 = vmatpush.msrb.mxu2 %v2457_v7  ;;  %v1603_v39 = vand.u32 4294901760, %v1602_v4 }
 0x146   :  { %1466 = vmatpush.msra.mxu3 %v2426_v13  ;;  %1406 = vmatpush.msra.mxu1 %v1405_v25  ;;  %v1609_v40 = vand.u32 4294901760, %v1608_v38 }
 0x147   :  { %1500 = vmatpush.msrb.mxu0 %v1397_v60  ;;  %1554 = vmatpush.msrb.mxu2 %v2463_v12 }
 0x148   :  { %1468 = vmatpush.msra.mxu3 %v2459_v5  ;;  %1446 = vmatmul.f32.vlgmr.msra.gmra.mxu2 %v2204_v32 }
 0x149   :  { %1504 = vmatpush.msrb.mxu0 %v1403_v15  ;;  %1556 = vmatpush.msrb.mxu2 %v2470_v20 }
 0x14a   :  { %1412 = vmatpush.msra.mxu1 %v1411_v28  ;;  %1470 = vmatpush.msra.mxu3 %v2446_v49 }
 0x14b   :  { %1368 = vmatmul.f32.vlgmr.msra.gmra.mxu0 %v2247_v62  ;;  %1474 = vmatmul.f32.vlgmr.msra.gmra.mxu3 %v2225_v44 }
 0x14c   :  { %1508 = vmatpush.msrb.mxu0 %v1409_v59  ;;  %1526 = vmatpush.msrb.mxu1 %v2434_v42 }
 0x14d   :  { %1558 = vmatpush.msrb.mxu2 %v2475_v63  ;;  %1586 = vmatpush.msrb.mxu3 %v1585_v34 }
 0x14e   :  { %1629 = vmatpush.msra.mxu0 %v1582_v19  ;;  %1414 = vmatmul.f32.vlgmr.msra.gmra.mxu1 %v2176_v18 }
 0x14f   :  { %1560 = vmatpush.msrb.mxu2 %v2480_v11  ;;  %1528 = vmatpush.msrb.mxu1 %v2436_v43 }
 0x150   :  { %1592 = vmatpush.msrb.mxu3 %v1591_v36  ;;  %1632 = vmatpush.msra.mxu0 %v1588_v6 }
 0x151   :  { %1690 = vmatpush.msra.mxu2 %v1583_v23  ;;  %1530 = vmatpush.msrb.mxu1 %v2426_v13 }
 0x152   :  { %1598 = vmatpush.msrb.mxu3 %v1597_v37  ;;  %1635 = vmatpush.msra.mxu0 %v1594_v24 }
 0x153   :  { %1694 = vmatpush.msra.mxu2 %v1589_v26  ;;  %1532 = vmatpush.msrb.mxu1 %v2459_v5 }
 0x154   :  { %1604 = vmatpush.msrb.mxu3 %v1603_v39  ;;  %1566 = vmatmul.f32.vlgmr.msrb.gmra.mxu2 %v2247_v62 }
 0x155   :  { %1638 = vmatpush.msra.mxu0 %v1600_v27  ;;  %1698 = vmatpush.msra.mxu2 %v1595_v30 }
 0x156   :  { %1510 = vmatmul.f32.vlgmr.msrb.gmra.mxu0 %v2176_v18  ;;  %1534 = vmatpush.msrb.mxu1 %v2446_v49 }
 0x157   :  { %1610 = vmatpush.msrb.mxu3 %v1609_v40  ;;  %1641 = vmatpush.msra.mxu0 %v1606_v56 }
 0x158   :  { %1612 = vmatmul.f32.vlgmr.msrb.gmra.mxu3 %v2176_v18  ;;  %1660 = vmatpush.msra.mxu1 %v2457_v7 }
 0x159   :  { %1702 = vmatpush.msra.mxu2 %v1601_v33  ;;  %1724 = vmatpush.msra.mxu3 %v2457_v7 }
 0x15a   :  { %1536 = vmatmul.f32.vlgmr.msrb.gmra.mxu1 %v2176_v18 }
 0x15b   :  { %1662 = vmatpush.msra.mxu1 %v2463_v12  ;;  %1706 = vmatpush.msra.mxu2 %v1607_v35 }
 0x15c   :  { %1726 = vmatpush.msra.mxu3 %v2463_v12  ;;  %1708 = vmatmul.f32.vlgmr.msra.gmra.mxu2 %v2176_v18 }
 0x15d   :  { %1664 = vmatpush.msra.mxu1 %v2470_v20 }
 0x15e   :  { %1728 = vmatpush.msra.mxu3 %v2470_v20  ;;  %1644 = vmatmul.f32.vlgmr.msra.gmra.mxu0 %v2204_v32  ;;  %v1738_v32 = vld [vmem:[#allocation8] sm:$0x3f] }
 0x15f   :  { %1666 = vmatpush.msra.mxu1 %v2475_v63  ;;  %vm1739_vm12 = vcmp.ne.f32.partialorder %v1738_v32, 0.0 }
 0x160   :  { %1730 = vmatpush.msra.mxu3 %v2475_v63  ;;  %v2519_v47 = vsel %vm1739_vm12, 1, %v1967_v51 }
 0x161   :  { %1668 = vmatpush.msra.mxu1 %v2480_v11  ;;  %v1742_v0 = vperm.slane %v2519_v47, 1  ;;  %v1744_v32 = vperm.slane %v2519_v47, 3 }
 0x162   :  { %1732 = vmatpush.msra.mxu3 %v2480_v11  ;;  %1672 = vmatmul.f32.vlgmr.msra.gmra.mxu1 %v2225_v44 }
 0x163   :  { %1734 = vmatmul.f32.vlgmr.msra.gmra.mxu3 %v2176_v18  ;;  %v1741_v18 = vperm.slane %v2519_v47, 0  ;;  %vm1748_vm14 = vcmp.eq.s32.totalorder %v1742_v0, 1  ;;  %vm1750_vm0 = vcmp.eq.s32.totalorder %v1744_v32, 1 }
 0x165   :  { %vm1747_vm13 = vcmp.eq.s32.totalorder %v1741_v18, 1 }
 0x172   :  { %v577_v62 = vpop.f32.mrf.mxu0 }
 0x178   :  { %v683_v41 = vpop.f32.mrf.mxu3 }
 0x17b   :  { %v655_v42 = vpop.f32.mrf.mxu2 }
 0x17c   :  { %v623_v13 = vpop.f32.mrf.mxu1 }
 0x17d   :  { %v624_v17 = vadd.f32 %v623_v13, %v577_v62 }
 0x17e   :  { %v719_v43 = vpop.f32.mrf.mxu0 }
 0x17f   :  { %v656_v45 = vadd.f32 %v655_v42, %v624_v17  ;;  %v1743_v42 = vperm.slane %v2519_v47, 2 }
 0x181   :  { %v684_v46 = vadd.f32 %v683_v41, %v656_v45  ;;  %vm1749_vm15 = vcmp.eq.s32.totalorder %v1743_v42, 1 }
 0x183   :  { %v720_v54 = vadd.f32 %v719_v43, %v684_v46 }
 0x184   :  { %v821_v48 = vpop.f32.mrf.mxu3 }
 0x187   :  { %v775_v50 = vpop.f32.mrf.mxu2 }
 0x188   :  { %v745_v49 = vpop.f32.mrf.mxu1  ;;  %v822_v44 = vadd.f32 %v821_v48, %v775_v50 }
 0x189   :  { %v746_v58 = vadd.f32 %v745_v49, %v720_v54  ;;  %v1745_v49 = vperm.slane %v2519_v47, 4 }
 0x18a   :  { %v853_v55 = vpop.f32.mrf.mxu0 }
 0x18b   :  { %v854_v60 = vadd.f32 %v853_v55, %v822_v44  ;;  %v1753_v2 = vsel %vm1747_vm13, %v746_v58, 0.0  ;;  %vm1751_vm1 = vcmp.eq.s32.totalorder %v1745_v49, 1 }
 0x18c   :  { %v1774_v12 = vmul.f32 %v1753_v2, %v1753_v2  ;;  %v1759_v16 = vsel %vm531_vm10, %v1753_v2, 0.0 }
 0x18e   :  { %v1780_v20 = vsel %vm531_vm10, %v1774_v12, 0.0  ;;  %v1746_v12 = vperm.slane %v2519_v47, 5 }
 0x190   :  { %v881_v61 = vpop.f32.mrf.mxu1  ;;  %vm1752_vm2 = vcmp.eq.s32.totalorder %v1746_v12, 1 }
 0x191   :  { %v882_v7 = vadd.f32 %v881_v61, %v854_v60 }
 0x192   :  { %v917_v5 = vpop.f32.mrf.mxu2  ;;  %v943_v52 = vpop.f32.mrf.mxu3 }
 0x193   :  { %v918_v10 = vadd.f32 %v917_v5, %v882_v7  ;;  %v973_v8 = vpop.f32.mrf.mxu0 }
 0x195   :  { %v944_v57 = vadd.f32 %v943_v52, %v918_v10 }
 0x197   :  { %v1754_v53 = vsel %vm1748_vm14, %v944_v57, 0.0  ;;  %v1796_v19 = vrot.slane %v944_v57, 4 }
 0x198   :  { %v1760_v59 = vsel %vm531_vm10, %v1754_v53, 0.0  ;;  %v1775_v3 = vmul.f32 %v1754_v53, %v1754_v53  ;;  %v1019_v21 = vpop.f32.mrf.mxu1 }
 0x199   :  { %v2526_v15 = vadd.f32 %v1760_v59, %v1759_v16  ;;  %v1797_v63 = vsel %vm531_vm10, %v746_v58, %v1796_v19  ;;  %v1020_v22 = vadd.f32 %v1019_v21, %v973_v8 }
 0x19a   :  { %v1781_v6 = vsel %vm531_vm10, %v1775_v3, 0.0  ;;  %1799 = vst [vmem:[#allocation9] sm:$0xff] %v1797_v63  ;;  %v1051_v14 = vpop.f32.mrf.mxu2  ;;  %v1079_v23 = vpop.f32.mrf.mxu3 }
 0x19b   :  { %v2530_v9 = vadd.f32 %v1781_v6, %v1780_v20  ;;  %v1052_v24 = vadd.f32 %v1051_v14, %v1020_v22  ;;  %v1115_v25 = vpop.f32.mrf.mxu0 }
 0x19d   :  { %v1080_v11 = vadd.f32 %v1079_v23, %v1052_v24 }
 0x19f   :  { %v1116_v26 = vadd.f32 %v1115_v25, %v1080_v11 }
 0x1a2   :  { %v1141_v27 = vpop.f32.mrf.mxu1 }
 0x1a3   :  { %v1142_v28 = vadd.f32 %v1141_v27, %v1116_v26 }
 0x1a5   :  { %1800 = vst [vmem:[#allocation9 + $0x8] sm:$0xf] %v1142_v28  ;;  %v1755_v58 = vsel %vm1749_vm15, %v1142_v28, 0.0 }
 0x1a6   :  { %v1776_v2 = vmul.f32 %v1755_v58, %v1755_v58  ;;  %v1762_v10 = vsel %vm531_vm10, %v1755_v58, 0.0 }
 0x1a7   :  { %v1763_v20 = vadd.f32 %v1762_v10, %v2526_v15 }
 0x1a8   :  { %v1783_v16 = vsel %vm531_vm10, %v1776_v2, 0.0 }
 0x1a9   :  { %v1784_v47 = vadd.f32 %v1783_v16, %v2530_v9 }
 0x1ae   :  { %v1249_v56 = vpop.f32.mrf.mxu0  ;;  %v1277_v31 = vpop.f32.mrf.mxu1 }
 0x1b2   :  { %v1171_v29 = vpop.f32.mrf.mxu2 }
 0x1ba   :  { %v1217_v30 = vpop.f32.mrf.mxu3 }
 0x1bb   :  { %v1218_v35 = vadd.f32 %v1217_v30, %v1171_v29 }
 0x1bc   :  { %v1313_v33 = vpop.f32.mrf.mxu2 }
 0x1bd   :  { %v1250_v38 = vadd.f32 %v1249_v56, %v1218_v35 }
 0x1bf   :  { %v1278_v13 = vadd.f32 %v1277_v31, %v1250_v38 }
 0x1c1   :  { %v1314_v43 = vadd.f32 %v1313_v33, %v1278_v13 }
 0x1c4   :  { %v1339_v34 = vpop.f32.mrf.mxu3 }
 0x1c5   :  { %v1340_v48 = vadd.f32 %v1339_v34, %v1314_v43 }
 0x1c7   :  { %v1756_v61 = vsel %vm1750_vm0, %v1340_v48, 0.0 }
 0x1c8   :  { %v1369_v1 = vpop.f32.mrf.mxu0  ;;  %v1777_v8 = vmul.f32 %v1756_v61, %v1756_v61  ;;  %v1764_v53 = vsel %vm531_vm10, %v1756_v61, 0.0 }
 0x1c9   :  { %v1765_v21 = vadd.f32 %v1764_v53, %v1763_v20 }
 0x1ca   :  { %v1785_v59 = vsel %vm531_vm10, %v1777_v8, 0.0 }
 0x1cb   :  { %v1415_v36 = vpop.f32.mrf.mxu1  ;;  %v1447_v4 = vpop.f32.mrf.mxu2  ;;  %v1786_v24 = vadd.f32 %v1785_v59, %v1784_v47 }
 0x1cc   :  { %v1416_v37 = vadd.f32 %v1415_v36, %v1369_v1 }
 0x1ce   :  { %v1448_v39 = vadd.f32 %v1447_v4, %v1416_v37  ;;  %v1475_v40 = vpop.f32.mrf.mxu3 }
 0x1d0   :  { %v1476_v62 = vadd.f32 %v1475_v40, %v1448_v39 }
 0x1d3   :  { %v1511_v17 = vpop.f32.mrf.mxu0 }
 0x1d4   :  { %v1512_v41 = vadd.f32 %v1511_v17, %v1476_v62 }
 0x1d7   :  { %v1537_v45 = vpop.f32.mrf.mxu1  ;;  %v1567_v51 = vpop.f32.mrf.mxu2 }
 0x1d8   :  { %v1538_v46 = vadd.f32 %v1537_v45, %v1512_v41 }
 0x1da   :  { %v1803_v50 = vrot.slane %v1538_v46, 4  ;;  %v1757_v52 = vsel %vm1751_vm1, %v1538_v46, 0.0 }
 0x1db   :  { %v1613_v54 = vpop.f32.mrf.mxu3  ;;  %v1645_v44 = vpop.f32.mrf.mxu0  ;;  %v1778_v19 = vmul.f32 %v1757_v52, %v1757_v52  ;;  %v1766_v3 = vsel %vm531_vm10, %v1757_v52, 0.0 }
 0x1dc   :  { %v1804_v18 = vsel %vm531_vm10, %v1340_v48, %v1803_v50  ;;  %v1614_v55 = vadd.f32 %v1613_v54, %v1567_v51  ;;  %v1767_v23 = vadd.f32 %v1766_v3, %v1765_v21 }
 0x1dd   :  { %1807 = vst [vmem:[#allocation9 + $0xc] sm:$0xff] %v1804_v18  ;;  %v1787_v22 = vsel %vm531_vm10, %v1778_v19, 0.0 }
 0x1de   :  { %v1646_v60 = vadd.f32 %v1645_v44, %v1614_v55  ;;  %v1788_v26 = vadd.f32 %v1787_v22, %v1786_v24 }
 0x1df   :  { %v1673_v0 = vpop.f32.mrf.mxu1  ;;  %v1709_v5 = vpop.f32.mrf.mxu2 }
 0x1e0   :  { %v1674_v7 = vadd.f32 %v1673_v0, %v1646_v60 }
 0x1e2   :  { %v1710_v57 = vadd.f32 %v1709_v5, %v1674_v7 }
 0x1e6   :  { %v1735_v63 = vpop.f32.mrf.mxu3 }
 0x1e7   :  { %v1736_v6 = vadd.f32 %v1735_v63, %v1710_v57 }
 0x1e9   :  { %v1758_v14 = vsel %vm1752_vm2, %v1736_v6, 0.0  ;;  %1808 = vst [vmem:[#allocation9 + $0x14] sm:$0xf] %v1736_v6 }
 0x1ea   :  { %v1779_v25 = vmul.f32 %v1758_v14, %v1758_v14  ;;  %v1768_v15 = vsel %vm531_vm10, %v1758_v14, 0.0  ;;  %1821 = dma.vmem_to_hbm [thread:$0]  %s1814_s16, 384, %s1816_s19, [#allocation5], %s1956_s28, %s1956_s28, %s1957_s29  }
 0x1eb   :  { %v1769_v11 = vadd.f32 %v1768_v15, %v1767_v23 }
 0x1ec   :  { %v1789_v9 = vsel %vm531_vm10, %v1779_v25, 0.0 }
 0x1ed   :  { %1770 = vadd.xlane.f32.xlu0 %v1769_v11  ;;  %v1790_v27 = vadd.f32 %v1789_v9, %v1788_v26 }
 0x1ef   :  { %1791 = vadd.xlane.f32.xlu1 %v1790_v27 }
 0x260   :  { %v1771_v28 = vpop.xlane.xlu0 %1770 }
 0x261   :  { %1773 = vst.msk [vmem:[%s2563_s4] sm:$0xf] %vm1772_vm3, %v1771_v28 }
 0x262   :  { %v1792_v29 = vpop.xlane.xlu1 %1791 }
 0x263   :  { %1793 = vst.msk [vmem:[%s2564_s5] sm:$0xf] %vm1772_vm3, %v1792_v29 }
 0x264   :  { %1952 = dma.done.wait [#allocation5], 384  }
 0x265   :  { %1953 = vsyncadd [#allocation5], 4294966912 }
 0x266   :  { %1834 = vsyncpa [#allocation4], 1 }
 0x267   :  { %1835 = vsyncpa [#allocation7], 1 }
 0x268   :  { %1836 = vsyncpa [#allocation5], 1 }

</bundles_post_ra>
